<compile_context>
chip_gen: v5e
topology: v5e:2x2
jax: 0.10.0
libtpu: 0.0.40
codegen_flags: <defaults>
</compile_context>

<pallas_src>
import functools

import jax
import jax.numpy as jnp
from jax.experimental import pallas as pl
from jax.experimental.pallas import tpu as pltpu

EPS = 1e-5
LANES = 128
_VMEM_LIMIT_BYTES = 48 * 1024 * 1024     # explicit scoped-VMEM budget (fits v7x's 64 MiB)
_REF_PREC = jax.lax.Precision.HIGHEST    # reference path only


# ------------------------------- small helpers ------------------------------ #
def _cparams(n_axes=1):
  return pltpu.CompilerParams(
      dimension_semantics=("parallel",) * n_axes,
      vmem_limit_bytes=_VMEM_LIMIT_BYTES)


def _rup(n, m):
  return ((n + m - 1) // m) * m


def _pick_tile(m, target):
  """Largest multiple-of-8 divisor of m that is <= target (fallback: m)."""
  target = max(8, min(target, m))
  for t in range(target, 7, -1):
    if m % t == 0 and t % 8 == 0:
      return t
  return m


def _pad_last(a, c):
  p = c - a.shape[-1]
  if p == 0:
    return a
  return jnp.pad(a, [(0, 0)] * (a.ndim - 1) + [(0, p)])


def _pad2(a, r, c):
  return jnp.pad(a, ((0, r - a.shape[0]), (0, c - a.shape[1])))


def _pad3(a, r, c):
  return jnp.pad(a, ((0, 0), (0, r - a.shape[1]), (0, c - a.shape[2])))


# --------------- pass 1: matmul + per-tile BN partial statistics ------------ #
def _colstats(y):
  return jnp.concatenate([jnp.sum(y, axis=0, keepdims=True),
                          jnp.sum(y * y, axis=0, keepdims=True)], axis=0)


def _matmul_stats_kernel(x_ref, w_ref, y_ref, ps_ref):
  y = jnp.dot(x_ref[...], w_ref[...], preferred_element_type=jnp.float32)
  y_ref[...] = y.astype(y_ref.dtype)
  ps_ref[0] = _colstats(y)           # per-tile partial (sum, sumsq) in f32


def _matmul_stats(x2d, w2d, tile_m):
  M, K = x2d.shape
  C = w2d.shape[1]
  nt = M // tile_m
  return pl.pallas_call(
      _matmul_stats_kernel,
      out_shape=(jax.ShapeDtypeStruct((M, C), jnp.bfloat16),
                 jax.ShapeDtypeStruct((nt, 2, C), jnp.float32)),
      grid=(nt,),
      in_specs=[pl.BlockSpec((tile_m, K), lambda i: (i, 0)),
                pl.BlockSpec((K, C), lambda i: (0, 0))],
      out_specs=(pl.BlockSpec((tile_m, C), lambda i: (i, 0)),
                 pl.BlockSpec((1, 2, C), lambda i: (i, 0, 0))),
      compiler_params=_cparams(),
  )(x2d, w2d)


def _dual_matmul_stats_kernel(a_ref, b_ref, wa_ref, wb_ref,
                              ya_ref, yb_ref, pa_ref, pb_ref):
  ya = jnp.dot(a_ref[...], wa_ref[...], preferred_element_type=jnp.float32)
  yb = jnp.dot(b_ref[...], wb_ref[...], preferred_element_type=jnp.float32)
  ya_ref[...] = ya.astype(ya_ref.dtype)
  yb_ref[...] = yb.astype(yb_ref.dtype)
  pa_ref[0] = _colstats(ya)
  pb_ref[0] = _colstats(yb)


def _dual_matmul_stats(a, b, wa, wb, tile_m):
  """conv3 and shortcut 1x1 conv fused: one pass over the same M rows."""
  M, Ka = a.shape
  Kb = b.shape[1]
  C = wa.shape[1]
  nt = M // tile_m
  return pl.pallas_call(
      _dual_matmul_stats_kernel,
      out_shape=(jax.ShapeDtypeStruct((M, C), jnp.bfloat16),
                 jax.ShapeDtypeStruct((M, C), jnp.bfloat16),
                 jax.ShapeDtypeStruct((nt, 2, C), jnp.float32),
                 jax.ShapeDtypeStruct((nt, 2, C), jnp.float32)),
      grid=(nt,),
      in_specs=[pl.BlockSpec((tile_m, Ka), lambda i: (i, 0)),
                pl.BlockSpec((tile_m, Kb), lambda i: (i, 0)),
                pl.BlockSpec((Ka, C), lambda i: (0, 0)),
                pl.BlockSpec((Kb, C), lambda i: (0, 0))],
      out_specs=(pl.BlockSpec((tile_m, C), lambda i: (i, 0)),
                 pl.BlockSpec((tile_m, C), lambda i: (i, 0)),
                 pl.BlockSpec((1, 2, C), lambda i: (i, 0, 0)),
                 pl.BlockSpec((1, 2, C), lambda i: (i, 0, 0))),
      compiler_params=_cparams(),
  )(a, b, wa, wb)


# -------------- pass 1 (3x3 conv): 9 accumulated matmuls, no im2col --------- #
def _make_conv3x3_kernel(H2, W2, stride, n_phase):
  def kernel(*refs):
    phase_refs = refs[:n_phase]          # per-phase padded feature maps (bf16)
    w_ref = refs[n_phase]                # (9, C, C) tap weights (bf16)
    y_ref = refs[n_phase + 1]            # (H2, W2, C) output block (bf16)
    ps_ref = refs[n_phase + 2]           # (1, 2, C) per-image partial stats (f32)
    C = w_ref.shape[-1]
    ps_ref[...] = jnp.zeros_like(ps_ref)

    @pl.loop(0, H2)
    def _row(ho):
      acc = jnp.zeros((W2, C), jnp.float32)
      for di in range(3):
        r = ho * stride + di                       # padded input row (dynamic)
        for dj in range(3):
          p = dj % n_phase                         # column phase (static)
          c0 = dj // n_phase                       # static column offset
          xw = phase_refs[p][r, pl.ds(c0, W2), :]  # (W2, C) contiguous window
          acc = acc + jnp.dot(xw, w_ref[di * 3 + dj],
                              preferred_element_type=jnp.float32)
      y_ref[ho] = acc.astype(y_ref.dtype)
      ps_ref[0] = ps_ref[0] + _colstats(acc)
  return kernel


def _conv3x3_stats(phases, w_taps, H2, W2, stride):
  """phases: list of (N, Hp, Wpp, C) bf16 column-phase views of the padded map."""
  N, Hp = phases[0].shape[0], phases[0].shape[1]
  C = w_taps.shape[-1]
  n_phase = len(phases)
  flat = [p.reshape(N * Hp, p.shape[2], C) for p in phases]
  in_specs = [pl.BlockSpec((Hp, f.shape[1], C), lambda n: (n, 0, 0)) for f in flat]
  in_specs.append(pl.BlockSpec(w_taps.shape, lambda n: (0, 0, 0)))
  return pl.pallas_call(
      _make_conv3x3_kernel(H2, W2, stride, n_phase),
      out_shape=(jax.ShapeDtypeStruct((N * H2, W2, C), jnp.bfloat16),
                 jax.ShapeDtypeStruct((N, 2, C), jnp.float32)),
      grid=(N,),
      in_specs=in_specs,
      out_specs=(pl.BlockSpec((H2, W2, C), lambda n: (n, 0, 0)),
                 pl.BlockSpec((1, 2, C), lambda n: (n, 0, 0))),
      compiler_params=_cparams(),
  )(*flat, w_taps)


# ---------------------- pass 2: BN scale/shift epilogues -------------------- #
def _bn_act_kernel(y_ref, sc_ref, sh_ref, o_ref, *, relu):
  v = y_ref[...].astype(jnp.float32) * sc_ref[...] + sh_ref[...]
  if relu:
    v = jnp.maximum(v, 0.0)
  o_ref[...] = v.astype(o_ref.dtype)


def _bn_act(y, scale, shift, tile_m, *, relu, out_dtype):
  M, C = y.shape
  nt = M // tile_m
  return pl.pallas_call(
      functools.partial(_bn_act_kernel, relu=relu),
      out_shape=jax.ShapeDtypeStruct((M, C), out_dtype),
      grid=(nt,),
      in_specs=[pl.BlockSpec((tile_m, C), lambda i: (i, 0)),
                pl.BlockSpec((1, C), lambda i: (0, 0)),
                pl.BlockSpec((1, C), lambda i: (0, 0))],
      out_specs=pl.BlockSpec((tile_m, C), lambda i: (i, 0)),
      compiler_params=_cparams(),
  )(y, scale, shift)


def _bn_add_relu_kernel(y3_ref, ysc_ref, s3_ref, h3_ref, ss_ref, hs_ref, o_ref):
  main = jnp.maximum(y3_ref[...].astype(jnp.float32) * s3_ref[...] + h3_ref[...], 0.0)
  short = ysc_ref[...].astype(jnp.float32) * ss_ref[...] + hs_ref[...]
  o_ref[...] = jnp.maximum(main + short, 0.0)


def _bn_add_relu(y3, ysc, s3, h3, ss, hs, tile_m):
  M, C = y3.shape
  nt = M // tile_m
  vec = pl.BlockSpec((1, C), lambda i: (0, 0))
  tile = pl.BlockSpec((tile_m, C), lambda i: (i, 0))
  return pl.pallas_call(
      _bn_add_relu_kernel,
      out_shape=jax.ShapeDtypeStruct((M, C), jnp.float32),
      grid=(nt,),
      in_specs=[tile, tile, vec, vec, vec, vec],
      out_specs=tile,
      compiler_params=_cparams(),
  )(y3, ysc, s3, h3, ss, hs)


def _bn_add_relu_identity_kernel(y3_ref, scut_ref, s3_ref, h3_ref, o_ref):
  main = jnp.maximum(y3_ref[...].astype(jnp.float32) * s3_ref[...] + h3_ref[...], 0.0)
  o_ref[...] = jnp.maximum(main + scut_ref[...], 0.0)


def _bn_add_relu_identity(y3, scut, s3, h3, tile_m):
  M, C = y3.shape
  nt = M // tile_m
  vec = pl.BlockSpec((1, C), lambda i: (0, 0))
  tile = pl.BlockSpec((tile_m, C), lambda i: (i, 0))
  return pl.pallas_call(
      _bn_add_relu_identity_kernel,
      out_shape=jax.ShapeDtypeStruct((M, C), jnp.float32),
      grid=(nt,),
      in_specs=[tile, tile, vec, vec],
      out_specs=tile,
      compiler_params=_cparams(),
  )(y3, scut, s3, h3)


# --------------------------- BN coefficient folding ------------------------- #
def _bn_coeffs(partial_stats, count, gamma, beta, c_pad):
  st = jnp.sum(partial_stats, axis=0)                       # (2, C) f32
  mean = st[0] / count
  var = jnp.maximum(st[1] / count - mean * mean, 0.0)       # E[y^2] - mean^2
  g = _pad_last(gamma.astype(jnp.float32), c_pad)
  b = _pad_last(beta.astype(jnp.float32), c_pad)
  scale = g * jax.lax.rsqrt(var + EPS)
  shift = b - mean * scale
  return scale.reshape(1, c_pad), shift.reshape(1, c_pad)


# ------------------------------- block wrapper ------------------------------ #
def res_bottleneck_block(x_nchw, params, *, in_channels, out_channels,
                         downsample, tile_m_target=1024):
  mid = out_channels // 4
  s = 2 if downsample else 1
  has_sc_conv = downsample or (in_channels != out_channels)

  cin_p = _rup(in_channels, LANES)
  cmid_p = _rup(mid, LANES)
  cout_p = _rup(out_channels, LANES)

  x = jnp.transpose(x_nchw, (0, 2, 3, 1)).astype(jnp.float32)   # NCHW -> NHWC
  N, H, W, _ = x.shape
  H2 = (H + 2 - 3) // s + 1
  W2 = (W + 2 - 3) // s + 1
  M1 = N * H * W
  M3 = N * H2 * W2
  t1 = _pick_tile(M1, tile_m_target)
  t3 = _pick_tile(M3, tile_m_target)

  xpc = _pad_last(x, cin_p)                                      # lane-pad channels

  # ---- stage 1: 1x1 conv + BN + ReLU -------------------------------------- #
  x2d = xpc.reshape(M1, cin_p).astype(jnp.bfloat16)
  w1 = _pad2(params["w1"][:, :, 0, 0].T, cin_p, cmid_p).astype(jnp.bfloat16)
  y1_raw, ps1 = _matmul_stats(x2d, w1, t1)
  sc1, sh1 = _bn_coeffs(ps1, M1, params["g1"], params["beta1"], cmid_p)
  y1 = _bn_act(y1_raw, sc1, sh1, t1, relu=True, out_dtype=jnp.bfloat16)

  # ---- stage 2: 3x3 conv (stride s, pad 1) + BN + ReLU --------------------- #
  y1_img = y1.reshape(N, H, W, cmid_p)
  xp = jnp.pad(y1_img, ((0, 0), (1, 1), (1, 1), (0, 0)))         # spatial pad only
  if s == 1:
    phases = [xp]
  else:                                                          # column phases: no data blowup
    phases = [xp[:, :, 0::2, :], xp[:, :, 1::2, :]]
  w2 = jnp.transpose(params["w2"], (2, 3, 1, 0)).reshape(9, mid, mid)
  w2 = _pad3(w2, cmid_p, cmid_p).astype(jnp.bfloat16)
  y2_raw, ps2 = _conv3x3_stats(phases, w2, H2, W2, s)
  sc2, sh2 = _bn_coeffs(ps2, M3, params["g2"], params["beta2"], cmid_p)
  y2 = _bn_act(y2_raw.reshape(M3, cmid_p), sc2, sh2, t3,
               relu=True, out_dtype=jnp.bfloat16)

  # ---- stage 3: 1x1 conv + BN (+ fused shortcut) + ReLU -------------------- #
  w3 = _pad2(params["w3"][:, :, 0, 0].T, cmid_p, cout_p).astype(jnp.bfloat16)
  if has_sc_conv:
    xs = xpc[:, ::s, ::s, :].reshape(M3, cin_p).astype(jnp.bfloat16)
    wsc = _pad2(params["w_sc"][:, :, 0, 0].T, cin_p, cout_p).astype(jnp.bfloat16)
    y3_raw, ysc_raw, ps3, pssc = _dual_matmul_stats(y2, xs, w3, wsc, t3)
    sc3, sh3 = _bn_coeffs(ps3, M3, params["g3"], params["beta3"], cout_p)
    scs, shs = _bn_coeffs(pssc, M3, params["g_sc"], params["beta_sc"], cout_p)
    out2d = _bn_add_relu(y3_raw, ysc_raw, sc3, sh3, scs, shs, t3)
  else:
    y3_raw, ps3 = _matmul_stats(y2, w3, t3)
    sc3, sh3 = _bn_coeffs(ps3, M3, params["g3"], params["beta3"], cout_p)
    sc_raw = xpc.reshape(M3, cout_p)                             # identity shortcut (f32)
    out2d = _bn_add_relu_identity(y3_raw, sc_raw, sc3, sh3, t3)

  out = out2d.reshape(N, H2, W2, cout_p)[:, :, :, :out_channels]
  return jnp.transpose(out, (0, 3, 1, 2))                        # NHWC -> NCHW


# ----------------------------- pure-JAX reference --------------------------- #
def _conv2d_nchw(x, w, b, stride, padding):
  y = jax.lax.conv_general_dilated(
      x, w, window_strides=(stride, stride),
      padding=((padding, padding), (padding, padding)),
      dimension_numbers=("NCHW", "OIHW", "NCHW"), precision=_REF_PREC)
  return y + b.reshape(1, -1, 1, 1)


def _bn_train_nchw(x, gamma, beta):
  mean = jnp.mean(x, axis=(0, 2, 3), keepdims=True)
  var = jnp.mean((x - mean) ** 2, axis=(0, 2, 3), keepdims=True)
  return (gamma.reshape(1, -1, 1, 1) * (x - mean) * jax.lax.rsqrt(var + EPS)
          + beta.reshape(1, -1, 1, 1))


def _reference(x, p, *, in_channels, out_channels, downsample):
  s = 2 if downsample else 1
  if downsample or in_channels != out_channels:
    sc = _bn_train_nchw(_conv2d_nchw(x, p["w_sc"], p["b_sc"], s, 0),
                        p["g_sc"], p["beta_sc"])
  else:
    sc = x
  y = jax.nn.relu(_bn_train_nchw(_conv2d_nchw(x, p["w1"], p["b1"], 1, 0),
                                 p["g1"], p["beta1"]))
  y = jax.nn.relu(_bn_train_nchw(_conv2d_nchw(y, p["w2"], p["b2"], s, 1),
                                 p["g2"], p["beta2"]))
  y = jax.nn.relu(_bn_train_nchw(_conv2d_nchw(y, p["w3"], p["b3"], 1, 0),
                                 p["g3"], p["beta3"]))
  return jax.nn.relu(y + sc)


# ----------------------------------- main ----------------------------------- #
def _init_params(key, in_channels, out_channels):
  mid = out_channels // 4
  ks = jax.random.split(key, 12)
  n = lambda k, shape, scale=0.1: scale * jax.random.normal(k, shape, jnp.float32)
  return {
      "w1": n(ks[0], (mid, in_channels, 1, 1)), "b1": n(ks[1], (mid,)),
      "w2": n(ks[2], (mid, mid, 3, 3)),         "b2": n(ks[3], (mid,)),
      "w3": n(ks[4], (out_channels, mid, 1, 1)), "b3": n(ks[5], (out_channels,)),
      "w_sc": n(ks[6], (out_channels, in_channels, 1, 1)),
      "b_sc": n(ks[7], (out_channels,)),
      "g1": 1.0 + n(ks[8], (mid,)),  "beta1": n(ks[8], (mid,), 0.05),
      "g2": 1.0 + n(ks[9], (mid,)),  "beta2": n(ks[9], (mid,), 0.05),
      "g3": 1.0 + n(ks[10], (out_channels,)), "beta3": n(ks[10], (out_channels,), 0.05),
      "g_sc": 1.0 + n(ks[11], (out_channels,)), "beta_sc": n(ks[11], (out_channels,), 0.05),
  }


def _run_case(in_channels, out_channels, downsample, key):
  kx, kp = jax.random.split(key)
  x = jax.random.normal(kx, (2, in_channels, 16, 16), jnp.float32)
  params = _init_params(kp, in_channels, out_channels)
  run = functools.partial(res_bottleneck_block,
                          in_channels=in_channels,
                          out_channels=out_channels,
                          downsample=downsample,
                          tile_m_target=256)   # small target -> exercises multi-tile grid
  out = jax.block_until_ready(jax.jit(run)(x, params))
  ref = _reference(x, params, in_channels=in_channels,
                   out_channels=out_channels, downsample=downsample)
  assert out.shape == ref.shape, (out.shape, ref.shape)
  # bf16 MXU operands (f32 accumulation / f32 BN stats) -> relaxed tolerance.
  err = float(jnp.max(jnp.abs(out - ref)))
  rel = float(jnp.linalg.norm(out - ref) / (jnp.linalg.norm(ref) + 1e-8))
  assert err < 1e-1 and rel < 3e-2, (err, rel)


if __name__ == "__main__":
  key = jax.random.PRNGKey(0)
  k1, k2 = jax.random.split(key)
  _run_case(8, 16, True, k1)     # projection shortcut, stride-2 path
  _run_case(16, 16, False, k2)   # identity shortcut, stride-1 path
  print("KERNEL_OK")
</pallas_src>

<mosaic_0001>
module attributes {stable_mosaic.version = 11 : i64} {
  func.func @_matmul_stats_kernel(%arg0: i32, %arg1: memref<256x128xbf16, #tpu.memory_space<vmem>>, %arg2: memref<128x128xbf16, #tpu.memory_space<vmem>>, %arg3: memref<256x128xbf16, #tpu.memory_space<vmem>>, %arg4: memref<1x2x128xf32, #tpu.memory_space<vmem>>) attributes {dimension_semantics = [#tpu.dimension_semantics<parallel>], iteration_bounds = array<i64: 2>, scalar_prefetch = 0 : i64, scratch_operands = 0 : i64, tpu.core_type = #tpu.core_type<tc>, window_params = [{transform_indices = @transform_0, window_bounds = array<i64: 256, 128>}, {pipeline_mode = #tpu.pipeline_mode<synchronous>, transform_indices = @transform_1, window_bounds = array<i64: 128, 128>}, {transform_indices = @transform_2, window_bounds = array<i64: 256, 128>}, {transform_indices = @transform_3, window_bounds = array<i64: 1, 2, 128>}]} {
    %c0 = arith.constant 0 : index
    %c0_0 = arith.constant 0 : index
    %0 = vector.load %arg1[%c0, %c0_0] : memref<256x128xbf16, #tpu.memory_space<vmem>>, vector<256x128xbf16>
    %c0_1 = arith.constant 0 : index
    %c0_2 = arith.constant 0 : index
    %1 = vector.load %arg2[%c0_1, %c0_2] : memref<128x128xbf16, #tpu.memory_space<vmem>>, vector<128x128xbf16>
    %cst = arith.constant dense<0.000000e+00> : vector<256x128xf32>
    %2 = tpu.matmul %0, %1, %cst {dimension_numbers = #tpu.dot_dimension_numbers<[1], [0], [0], [1], [0, 0, 1, 1], [], []>} : vector<256x128xbf16>, vector<128x128xbf16>, vector<256x128xf32> -> vector<256x128xf32>
    %3 = arith.truncf %2 : vector<256x128xf32> to vector<256x128xbf16>
    %c0_3 = arith.constant 0 : index
    %c0_4 = arith.constant 0 : index
    %4 = vector.load %arg3[%c0_3, %c0_4] : memref<256x128xbf16, #tpu.memory_space<vmem>>, vector<256x128xbf16>
    tpu.vector_store %arg3[%c0_3, %c0_4], %3 {strides = array<i32>} : memref<256x128xbf16, #tpu.memory_space<vmem>>, vector<256x128xbf16>,
    %cst_5 = arith.constant dense<0.000000e+00> : vector<128xf32>
    %5 = vector.multi_reduction <add>, %2, %cst_5 [0] : vector<256x128xf32> to vector<128xf32>
    %6 = vector.shape_cast %5 : vector<128xf32> to vector<1x128xf32>
    %7 = arith.mulf %2, %2 : vector<256x128xf32>
    %cst_6 = arith.constant dense<0.000000e+00> : vector<128xf32>
    %8 = vector.multi_reduction <add>, %7, %cst_6 [0] : vector<256x128xf32> to vector<128xf32>
    %9 = vector.shape_cast %8 : vector<128xf32> to vector<1x128xf32>
    %10 = tpu.concatenate %6, %9 in 0 : vector<1x128xf32>, vector<1x128xf32> -> vector<2x128xf32>
    %c0_7 = arith.constant 0 : index
    %c0_8 = arith.constant 0 : index
    %c0_9 = arith.constant 0 : index
    %11 = vector.load %arg4[%c0_7, %c0_8, %c0_9] : memref<1x2x128xf32, #tpu.memory_space<vmem>>, vector<1x2x128xf32>
    %12 = vector.shape_cast %11 : vector<1x2x128xf32> to vector<2x128xf32>
    %13 = vector.shape_cast %10 : vector<2x128xf32> to vector<1x2x128xf32>
    tpu.vector_store %arg4[%c0_7, %c0_8, %c0_9], %13 {strides = array<i32>} : memref<1x2x128xf32, #tpu.memory_space<vmem>>, vector<1x2x128xf32>,
    return
  }
  func.func @transform_0(%arg0: i32) -> (i32, i32) {
    %c0_i32 = arith.constant 0 : i32
    %c0_i32_0 = arith.constant 0 : i32
    return %arg0, %c0_i32 : i32, i32
  }
  func.func @transform_1(%arg0: i32) -> (i32, i32) {
    %c0_i32 = arith.constant 0 : i32
    %c0_i32_0 = arith.constant 0 : i32
    %c0_i32_1 = arith.constant 0 : i32
    return %c0_i32, %c0_i32_0 : i32, i32
  }
  func.func @transform_2(%arg0: i32) -> (i32, i32) {
    %c0_i32 = arith.constant 0 : i32
    %c0_i32_0 = arith.constant 0 : i32
    return %arg0, %c0_i32 : i32, i32
  }
  func.func @transform_3(%arg0: i32) -> (i32, i32, i32) {
    %c0_i32 = arith.constant 0 : i32
    %c0_i32_0 = arith.constant 0 : i32
    %c0_i32_1 = arith.constant 0 : i32
    return %arg0, %c0_i32, %c0_i32_0 : i32, i32, i32
  }
}

module attributes {stable_mosaic.version = 11 : i64} {
  func.func @_bn_act_kernel(%arg0: i32, %arg1: memref<256x128xbf16, #tpu.memory_space<vmem>>, %arg2: memref<1x128xf32, #tpu.memory_space<vmem>>, %arg3: memref<1x128xf32, #tpu.memory_space<vmem>>, %arg4: memref<256x128xbf16, #tpu.memory_space<vmem>>) attributes {dimension_semantics = [#tpu.dimension_semantics<parallel>], iteration_bounds = array<i64: 2>, scalar_prefetch = 0 : i64, scratch_operands = 0 : i64, tpu.core_type = #tpu.core_type<tc>, window_params = [{transform_indices = @transform_0, window_bounds = array<i64: 256, 128>}, {pipeline_mode = #tpu.pipeline_mode<synchronous>, transform_indices = @transform_1, window_bounds = array<i64: 1, 128>}, {pipeline_mode = #tpu.pipeline_mode<synchronous>, transform_indices = @transform_2, window_bounds = array<i64: 1, 128>}, {transform_indices = @transform_3, window_bounds = array<i64: 256, 128>}]} {
    %c0 = arith.constant 0 : index
    %c0_0 = arith.constant 0 : index
    %0 = vector.load %arg1[%c0, %c0_0] : memref<256x128xbf16, #tpu.memory_space<vmem>>, vector<256x128xbf16>
    %1 = arith.extf %0 : vector<256x128xbf16> to vector<256x128xf32>
    %c0_1 = arith.constant 0 : index
    %c0_2 = arith.constant 0 : index
    %2 = vector.load %arg2[%c0_1, %c0_2] : memref<1x128xf32, #tpu.memory_space<vmem>>, vector<1x128xf32>
    %3 = vector.broadcast %2 : vector<1x128xf32> to vector<256x128xf32>
    %4 = arith.mulf %1, %3 : vector<256x128xf32>
    %c0_3 = arith.constant 0 : index
    %c0_4 = arith.constant 0 : index
    %5 = vector.load %arg3[%c0_3, %c0_4] : memref<1x128xf32, #tpu.memory_space<vmem>>, vector<1x128xf32>
    %6 = vector.broadcast %5 : vector<1x128xf32> to vector<256x128xf32>
    %7 = arith.addf %4, %6 : vector<256x128xf32>
    %cst = arith.constant 0.000000e+00 : f32
    %8 = vector.broadcast %cst : f32 to vector<256x128xf32>
    %9 = arith.maximumf %7, %8 : vector<256x128xf32>
    %10 = arith.truncf %9 : vector<256x128xf32> to vector<256x128xbf16>
    %c0_5 = arith.constant 0 : index
    %c0_6 = arith.constant 0 : index
    %11 = vector.load %arg4[%c0_5, %c0_6] : memref<256x128xbf16, #tpu.memory_space<vmem>>, vector<256x128xbf16>
    tpu.vector_store %arg4[%c0_5, %c0_6], %10 {strides = array<i32>} : memref<256x128xbf16, #tpu.memory_space<vmem>>, vector<256x128xbf16>,
    return
  }
  func.func @transform_0(%arg0: i32) -> (i32, i32) {
    %c0_i32 = arith.constant 0 : i32
    %c0_i32_0 = arith.constant 0 : i32
    return %arg0, %c0_i32 : i32, i32
  }
  func.func @transform_1(%arg0: i32) -> (i32, i32) {
    %c0_i32 = arith.constant 0 : i32
    %c0_i32_0 = arith.constant 0 : i32
    %c0_i32_1 = arith.constant 0 : i32
    return %c0_i32, %c0_i32_0 : i32, i32
  }
  func.func @transform_2(%arg0: i32) -> (i32, i32) {
    %c0_i32 = arith.constant 0 : i32
    %c0_i32_0 = arith.constant 0 : i32
    %c0_i32_1 = arith.constant 0 : i32
    return %c0_i32, %c0_i32_0 : i32, i32
  }
  func.func @transform_3(%arg0: i32) -> (i32, i32) {
    %c0_i32 = arith.constant 0 : i32
    %c0_i32_0 = arith.constant 0 : i32
    return %arg0, %c0_i32 : i32, i32
  }
}

module attributes {stable_mosaic.version = 11 : i64} {
  func.func @_bn_act_kernel(%arg0: i32, %arg1: memref<128x128xbf16, #tpu.memory_space<vmem>>, %arg2: memref<1x128xf32, #tpu.memory_space<vmem>>, %arg3: memref<1x128xf32, #tpu.memory_space<vmem>>, %arg4: memref<128x128xbf16, #tpu.memory_space<vmem>>) attributes {dimension_semantics = [#tpu.dimension_semantics<parallel>], iteration_bounds = array<i64: 1>, scalar_prefetch = 0 : i64, scratch_operands = 0 : i64, tpu.core_type = #tpu.core_type<tc>, window_params = [{transform_indices = @transform_0, window_bounds = array<i64: 128, 128>}, {pipeline_mode = #tpu.pipeline_mode<synchronous>, transform_indices = @transform_1, window_bounds = array<i64: 1, 128>}, {pipeline_mode = #tpu.pipeline_mode<synchronous>, transform_indices = @transform_2, window_bounds = array<i64: 1, 128>}, {transform_indices = @transform_3, window_bounds = array<i64: 128, 128>}]} {
    %c0 = arith.constant 0 : index
    %c0_0 = arith.constant 0 : index
    %0 = vector.load %arg1[%c0, %c0_0] : memref<128x128xbf16, #tpu.memory_space<vmem>>, vector<128x128xbf16>
    %1 = arith.extf %0 : vector<128x128xbf16> to vector<128x128xf32>
    %c0_1 = arith.constant 0 : index
    %c0_2 = arith.constant 0 : index
    %2 = vector.load %arg2[%c0_1, %c0_2] : memref<1x128xf32, #tpu.memory_space<vmem>>, vector<1x128xf32>
    %3 = vector.broadcast %2 : vector<1x128xf32> to vector<128x128xf32>
    %4 = arith.mulf %1, %3 : vector<128x128xf32>
    %c0_3 = arith.constant 0 : index
    %c0_4 = arith.constant 0 : index
    %5 = vector.load %arg3[%c0_3, %c0_4] : memref<1x128xf32, #tpu.memory_space<vmem>>, vector<1x128xf32>
    %6 = vector.broadcast %5 : vector<1x128xf32> to vector<128x128xf32>
    %7 = arith.addf %4, %6 : vector<128x128xf32>
    %cst = arith.constant 0.000000e+00 : f32
    %8 = vector.broadcast %cst : f32 to vector<128x128xf32>
    %9 = arith.maximumf %7, %8 : vector<128x128xf32>
    %10 = arith.truncf %9 : vector<128x128xf32> to vector<128x128xbf16>
    %c0_5 = arith.constant 0 : index
    %c0_6 = arith.constant 0 : index
    %11 = vector.load %arg4[%c0_5, %c0_6] : memref<128x128xbf16, #tpu.memory_space<vmem>>, vector<128x128xbf16>
    tpu.vector_store %arg4[%c0_5, %c0_6], %10 {strides = array<i32>} : memref<128x128xbf16, #tpu.memory_space<vmem>>, vector<128x128xbf16>,
    return
  }
  func.func @transform_0(%arg0: i32) -> (i32, i32) {
    %c0_i32 = arith.constant 0 : i32
    %c0_i32_0 = arith.constant 0 : i32
    return %arg0, %c0_i32 : i32, i32
  }
  func.func @transform_1(%arg0: i32) -> (i32, i32) {
    %c0_i32 = arith.constant 0 : i32
    %c0_i32_0 = arith.constant 0 : i32
    %c0_i32_1 = arith.constant 0 : i32
    return %c0_i32, %c0_i32_0 : i32, i32
  }
  func.func @transform_2(%arg0: i32) -> (i32, i32) {
    %c0_i32 = arith.constant 0 : i32
    %c0_i32_0 = arith.constant 0 : i32
    %c0_i32_1 = arith.constant 0 : i32
    return %c0_i32, %c0_i32_0 : i32, i32
  }
  func.func @transform_3(%arg0: i32) -> (i32, i32) {
    %c0_i32 = arith.constant 0 : i32
    %c0_i32_0 = arith.constant 0 : i32
    return %arg0, %c0_i32 : i32, i32
  }
}

module attributes {stable_mosaic.version = 11 : i64} {
  func.func @kernel(%arg0: i32, %arg1: memref<18x9x128xbf16, #tpu.memory_space<vmem>>, %arg2: memref<18x9x128xbf16, #tpu.memory_space<vmem>>, %arg3: memref<9x128x128xbf16, #tpu.memory_space<vmem>>, %arg4: memref<8x8x128xbf16, #tpu.memory_space<vmem>>, %arg5: memref<1x2x128xf32, #tpu.memory_space<vmem>>) attributes {dimension_semantics = [#tpu.dimension_semantics<parallel>], iteration_bounds = array<i64: 2>, scalar_prefetch = 0 : i64, scratch_operands = 0 : i64, tpu.core_type = #tpu.core_type<tc>, window_params = [{transform_indices = @transform_0, window_bounds = array<i64: 18, 9, 128>}, {transform_indices = @transform_1, window_bounds = array<i64: 18, 9, 128>}, {pipeline_mode = #tpu.pipeline_mode<synchronous>, transform_indices = @transform_2, window_bounds = array<i64: 9, 128, 128>}, {transform_indices = @transform_3, window_bounds = array<i64: 8, 8, 128>}, {transform_indices = @transform_4, window_bounds = array<i64: 1, 2, 128>}]} {
    %cst = arith.constant 0.000000e+00 : f32
    %0 = vector.broadcast %cst : f32 to vector<1x2x128xf32>
    %c0 = arith.constant 0 : index
    %c0_0 = arith.constant 0 : index
    %c0_1 = arith.constant 0 : index
    %1 = vector.load %arg5[%c0, %c0_0, %c0_1] : memref<1x2x128xf32, #tpu.memory_space<vmem>>, vector<1x2x128xf32>
    tpu.vector_store %arg5[%c0, %c0_0, %c0_1], %0 {strides = array<i32>} : memref<1x2x128xf32, #tpu.memory_space<vmem>>, vector<1x2x128xf32>,
    %c0_i32 = arith.constant 0 : i32
    %c8_i32 = arith.constant 8 : i32
    %2 = arith.addi %c0_i32, %c8_i32 : i32
    %c1_i32 = arith.constant 1 : i32
    scf.for %arg6 = %c0_i32 to %2 step %c1_i32  : i32 {
      %c1_i32_3 = arith.constant 1 : i32
      %3 = arith.muli %arg6, %c1_i32_3 : i32
      %c0_i32_4 = arith.constant 0 : i32
      %4 = arith.addi %c0_i32_4, %3 : i32
      %cst_5 = arith.constant 0.000000e+00 : f32
      %5 = vector.broadcast %cst_5 : f32 to vector<8x128xf32>
      %c2_i32 = arith.constant 2 : i32
      %6 = arith.muli %4, %c2_i32 : i32
      %c0_i32_6 = arith.constant 0 : i32
      %7 = arith.addi %6, %c0_i32_6 : i32
      %8 = arith.index_cast %7 : i32 to index
      %c0_7 = arith.constant 0 : index
      %c0_8 = arith.constant 0 : index
      %9 = vector.load %arg1[%8, %c0_7, %c0_8] : memref<18x9x128xbf16, #tpu.memory_space<vmem>>, vector<1x8x128xbf16>
      %10 = vector.shape_cast %9 : vector<1x8x128xbf16> to vector<8x128xbf16>
      %c0_9 = arith.constant 0 : index
      %c0_10 = arith.constant 0 : index
      %c0_11 = arith.constant 0 : index
      %11 = vector.load %arg3[%c0_9, %c0_10, %c0_11] : memref<9x128x128xbf16, #tpu.memory_space<vmem>>, vector<1x128x128xbf16>
      %12 = vector.shape_cast %11 : vector<1x128x128xbf16> to vector<128x128xbf16>
      %cst_12 = arith.constant dense<0.000000e+00> : vector<8x128xf32>
      %13 = tpu.matmul %10, %12, %cst_12 {dimension_numbers = #tpu.dot_dimension_numbers<[1], [0], [0], [1], [0, 0, 1, 1], [], []>} : vector<8x128xbf16>, vector<128x128xbf16>, vector<8x128xf32> -> vector<8x128xf32>
      %14 = arith.addf %5, %13 : vector<8x128xf32>
      %15 = arith.index_cast %7 : i32 to index
      %c0_13 = arith.constant 0 : index
      %c0_14 = arith.constant 0 : index
      %16 = vector.load %arg2[%15, %c0_13, %c0_14] : memref<18x9x128xbf16, #tpu.memory_space<vmem>>, vector<1x8x128xbf16>
      %17 = vector.shape_cast %16 : vector<1x8x128xbf16> to vector<8x128xbf16>
      %c1 = arith.constant 1 : index
      %c0_15 = arith.constant 0 : index
      %c0_16 = arith.constant 0 : index
      %18 = vector.load %arg3[%c1, %c0_15, %c0_16] : memref<9x128x128xbf16, #tpu.memory_space<vmem>>, vector<1x128x128xbf16>
      %19 = vector.shape_cast %18 : vector<1x128x128xbf16> to vector<128x128xbf16>
      %cst_17 = arith.constant dense<0.000000e+00> : vector<8x128xf32>
      %20 = tpu.matmul %17, %19, %cst_17 {dimension_numbers = #tpu.dot_dimension_numbers<[1], [0], [0], [1], [0, 0, 1, 1], [], []>} : vector<8x128xbf16>, vector<128x128xbf16>, vector<8x128xf32> -> vector<8x128xf32>
      %21 = arith.addf %14, %20 : vector<8x128xf32>
      %22 = arith.index_cast %7 : i32 to index
      %c1_18 = arith.constant 1 : index
      %c0_19 = arith.constant 0 : index
      %23 = vector.load %arg1[%22, %c1_18, %c0_19] : memref<18x9x128xbf16, #tpu.memory_space<vmem>>, vector<1x8x128xbf16>
      %24 = vector.shape_cast %23 : vector<1x8x128xbf16> to vector<8x128xbf16>
      %c2 = arith.constant 2 : index
      %c0_20 = arith.constant 0 : index
      %c0_21 = arith.constant 0 : index
      %25 = vector.load %arg3[%c2, %c0_20, %c0_21] : memref<9x128x128xbf16, #tpu.memory_space<vmem>>, vector<1x128x128xbf16>
      %26 = vector.shape_cast %25 : vector<1x128x128xbf16> to vector<128x128xbf16>
      %cst_22 = arith.constant dense<0.000000e+00> : vector<8x128xf32>
      %27 = tpu.matmul %24, %26, %cst_22 {dimension_numbers = #tpu.dot_dimension_numbers<[1], [0], [0], [1], [0, 0, 1, 1], [], []>} : vector<8x128xbf16>, vector<128x128xbf16>, vector<8x128xf32> -> vector<8x128xf32>
      %28 = arith.addf %21, %27 : vector<8x128xf32>
      %c2_i32_23 = arith.constant 2 : i32
      %29 = arith.muli %4, %c2_i32_23 : i32
      %c1_i32_24 = arith.constant 1 : i32
      %30 = arith.addi %29, %c1_i32_24 : i32
      %31 = arith.index_cast %30 : i32 to index
      %c0_25 = arith.constant 0 : index
      %c0_26 = arith.constant 0 : index
      %32 = vector.load %arg1[%31, %c0_25, %c0_26] : memref<18x9x128xbf16, #tpu.memory_space<vmem>>, vector<1x8x128xbf16>
      %33 = vector.shape_cast %32 : vector<1x8x128xbf16> to vector<8x128xbf16>
      %c3 = arith.constant 3 : index
      %c0_27 = arith.constant 0 : index
      %c0_28 = arith.constant 0 : index
      %34 = vector.load %arg3[%c3, %c0_27, %c0_28] : memref<9x128x128xbf16, #tpu.memory_space<vmem>>, vector<1x128x128xbf16>
      %35 = vector.shape_cast %34 : vector<1x128x128xbf16> to vector<128x128xbf16>
      %cst_29 = arith.constant dense<0.000000e+00> : vector<8x128xf32>
      %36 = tpu.matmul %33, %35, %cst_29 {dimension_numbers = #tpu.dot_dimension_numbers<[1], [0], [0], [1], [0, 0, 1, 1], [], []>} : vector<8x128xbf16>, vector<128x128xbf16>, vector<8x128xf32> -> vector<8x128xf32>
      %37 = arith.addf %28, %36 : vector<8x128xf32>
      %38 = arith.index_cast %30 : i32 to index
      %c0_30 = arith.constant 0 : index
      %c0_31 = arith.constant 0 : index
      %39 = vector.load %arg2[%38, %c0_30, %c0_31] : memref<18x9x128xbf16, #tpu.memory_space<vmem>>, vector<1x8x128xbf16>
      %40 = vector.shape_cast %39 : vector<1x8x128xbf16> to vector<8x128xbf16>
      %c4 = arith.constant 4 : index
      %c0_32 = arith.constant 0 : index
      %c0_33 = arith.constant 0 : index
      %41 = vector.load %arg3[%c4, %c0_32, %c0_33] : memref<9x128x128xbf16, #tpu.memory_space<vmem>>, vector<1x128x128xbf16>
      %42 = vector.shape_cast %41 : vector<1x128x128xbf16> to vector<128x128xbf16>
      %cst_34 = arith.constant dense<0.000000e+00> : vector<8x128xf32>
      %43 = tpu.matmul %40, %42, %cst_34 {dimension_numbers = #tpu.dot_dimension_numbers<[1], [0], [0], [1], [0, 0, 1, 1], [], []>} : vector<8x128xbf16>, vector<128x128xbf16>, vector<8x128xf32> -> vector<8x128xf32>
      %44 = arith.addf %37, %43 : vector<8x128xf32>
      %45 = arith.index_cast %30 : i32 to index
      %c1_35 = arith.constant 1 : index
      %c0_36 = arith.constant 0 : index
      %46 = vector.load %arg1[%45, %c1_35, %c0_36] : memref<18x9x128xbf16, #tpu.memory_space<vmem>>, vector<1x8x128xbf16>
      %47 = vector.shape_cast %46 : vector<1x8x128xbf16> to vector<8x128xbf16>
      %c5 = arith.constant 5 : index
      %c0_37 = arith.constant 0 : index
      %c0_38 = arith.constant 0 : index
      %48 = vector.load %arg3[%c5, %c0_37, %c0_38] : memref<9x128x128xbf16, #tpu.memory_space<vmem>>, vector<1x128x128xbf16>
      %49 = vector.shape_cast %48 : vector<1x128x128xbf16> to vector<128x128xbf16>
      %cst_39 = arith.constant dense<0.000000e+00> : vector<8x128xf32>
      %50 = tpu.matmul %47, %49, %cst_39 {dimension_numbers = #tpu.dot_dimension_numbers<[1], [0], [0], [1], [0, 0, 1, 1], [], []>} : vector<8x128xbf16>, vector<128x128xbf16>, vector<8x128xf32> -> vector<8x128xf32>
      %51 = arith.addf %44, %50 : vector<8x128xf32>
      %c2_i32_40 = arith.constant 2 : i32
      %52 = arith.muli %4, %c2_i32_40 : i32
      %c2_i32_41 = arith.constant 2 : i32
      %53 = arith.addi %52, %c2_i32_41 : i32
      %54 = arith.index_cast %53 : i32 to index
      %c0_42 = arith.constant 0 : index
      %c0_43 = arith.constant 0 : index
      %55 = vector.load %arg1[%54, %c0_42, %c0_43] : memref<18x9x128xbf16, #tpu.memory_space<vmem>>, vector<1x8x128xbf16>
      %56 = vector.shape_cast %55 : vector<1x8x128xbf16> to vector<8x128xbf16>
      %c6 = arith.constant 6 : index
      %c0_44 = arith.constant 0 : index
      %c0_45 = arith.constant 0 : index
      %57 = vector.load %arg3[%c6, %c0_44, %c0_45] : memref<9x128x128xbf16, #tpu.memory_space<vmem>>, vector<1x128x128xbf16>
      %58 = vector.shape_cast %57 : vector<1x128x128xbf16> to vector<128x128xbf16>
      %cst_46 = arith.constant dense<0.000000e+00> : vector<8x128xf32>
      %59 = tpu.matmul %56, %58, %cst_46 {dimension_numbers = #tpu.dot_dimension_numbers<[1], [0], [0], [1], [0, 0, 1, 1], [], []>} : vector<8x128xbf16>, vector<128x128xbf16>, vector<8x128xf32> -> vector<8x128xf32>
      %60 = arith.addf %51, %59 : vector<8x128xf32>
      %61 = arith.index_cast %53 : i32 to index
      %c0_47 = arith.constant 0 : index
      %c0_48 = arith.constant 0 : index
      %62 = vector.load %arg2[%61, %c0_47, %c0_48] : memref<18x9x128xbf16, #tpu.memory_space<vmem>>, vector<1x8x128xbf16>
      %63 = vector.shape_cast %62 : vector<1x8x128xbf16> to vector<8x128xbf16>
      %c7 = arith.constant 7 : index
      %c0_49 = arith.constant 0 : index
      %c0_50 = arith.constant 0 : index
      %64 = vector.load %arg3[%c7, %c0_49, %c0_50] : memref<9x128x128xbf16, #tpu.memory_space<vmem>>, vector<1x128x128xbf16>
      %65 = vector.shape_cast %64 : vector<1x128x128xbf16> to vector<128x128xbf16>
      %cst_51 = arith.constant dense<0.000000e+00> : vector<8x128xf32>
      %66 = tpu.matmul %63, %65, %cst_51 {dimension_numbers = #tpu.dot_dimension_numbers<[1], [0], [0], [1], [0, 0, 1, 1], [], []>} : vector<8x128xbf16>, vector<128x128xbf16>, vector<8x128xf32> -> vector<8x128xf32>
      %67 = arith.addf %60, %66 : vector<8x128xf32>
      %68 = arith.index_cast %53 : i32 to index
      %c1_52 = arith.constant 1 : index
      %c0_53 = arith.constant 0 : index
      %69 = vector.load %arg1[%68, %c1_52, %c0_53] : memref<18x9x128xbf16, #tpu.memory_space<vmem>>, vector<1x8x128xbf16>
      %70 = vector.shape_cast %69 : vector<1x8x128xbf16> to vector<8x128xbf16>
      %c8 = arith.constant 8 : index
      %c0_54 = arith.constant 0 : index
      %c0_55 = arith.constant 0 : index
      %71 = vector.load %arg3[%c8, %c0_54, %c0_55] : memref<9x128x128xbf16, #tpu.memory_space<vmem>>, vector<1x128x128xbf16>
      %72 = vector.shape_cast %71 : vector<1x128x128xbf16> to vector<128x128xbf16>
      %cst_56 = arith.constant dense<0.000000e+00> : vector<8x128xf32>
      %73 = tpu.matmul %70, %72, %cst_56 {dimension_numbers = #tpu.dot_dimension_numbers<[1], [0], [0], [1], [0, 0, 1, 1], [], []>} : vector<8x128xbf16>, vector<128x128xbf16>, vector<8x128xf32> -> vector<8x128xf32>
      %74 = arith.addf %67, %73 : vector<8x128xf32>
      %75 = arith.truncf %74 : vector<8x128xf32> to vector<8x128xbf16>
      %76 = arith.index_cast %4 : i32 to index
      %c0_57 = arith.constant 0 : index
      %c0_58 = arith.constant 0 : index
      %77 = vector.load %arg4[%76, %c0_57, %c0_58] : memref<8x8x128xbf16, #tpu.memory_space<vmem>>, vector<1x8x128xbf16>
      %78 = vector.shape_cast %77 : vector<1x8x128xbf16> to vector<8x128xbf16>
      %79 = vector.shape_cast %75 : vector<8x128xbf16> to vector<1x8x128xbf16>
      tpu.vector_store %arg4[%76, %c0_57, %c0_58], %79 {strides = array<i32>} : memref<8x8x128xbf16, #tpu.memory_space<vmem>>, vector<1x8x128xbf16>,
      %c0_59 = arith.constant 0 : index
      %c0_60 = arith.constant 0 : index
      %c0_61 = arith.constant 0 : index
      %80 = vector.load %arg5[%c0_59, %c0_60, %c0_61] : memref<1x2x128xf32, #tpu.memory_space<vmem>>, vector<1x2x128xf32>
      %81 = vector.shape_cast %80 : vector<1x2x128xf32> to vector<2x128xf32>
      %cst_62 = arith.constant dense<0.000000e+00> : vector<128xf32>
      %82 = vector.multi_reduction <add>, %74, %cst_62 [0] : vector<8x128xf32> to vector<128xf32>
      %83 = vector.shape_cast %82 : vector<128xf32> to vector<1x128xf32>
      %84 = arith.mulf %74, %74 : vector<8x128xf32>
      %cst_63 = arith.constant dense<0.000000e+00> : vector<128xf32>
      %85 = vector.multi_reduction <add>, %84, %cst_63 [0] : vector<8x128xf32> to vector<128xf32>
      %86 = vector.shape_cast %85 : vector<128xf32> to vector<1x128xf32>
      %87 = tpu.concatenate %83, %86 in 0 : vector<1x128xf32>, vector<1x128xf32> -> vector<2x128xf32>
      %88 = arith.addf %81, %87 : vector<2x128xf32>
      %c0_64 = arith.constant 0 : index
      %c0_65 = arith.constant 0 : index
      %c0_66 = arith.constant 0 : index
      %89 = vector.load %arg5[%c0_64, %c0_65, %c0_66] : memref<1x2x128xf32, #tpu.memory_space<vmem>>, vector<1x2x128xf32>
      %90 = vector.shape_cast %89 : vector<1x2x128xf32> to vector<2x128xf32>
      %91 = vector.shape_cast %88 : vector<2x128xf32> to vector<1x2x128xf32>
      tpu.vector_store %arg5[%c0_64, %c0_65, %c0_66], %91 {strides = array<i32>} : memref<1x2x128xf32, #tpu.memory_space<vmem>>, vector<1x2x128xf32>,
    }
    %c8_i32_2 = arith.constant 8 : i32
    return
  }
  func.func @transform_0(%arg0: i32) -> (i32, i32, i32) {
    %c0_i32 = arith.constant 0 : i32
    %c0_i32_0 = arith.constant 0 : i32
    %c0_i32_1 = arith.constant 0 : i32
    return %arg0, %c0_i32, %c0_i32_0 : i32, i32, i32
  }
  func.func @transform_1(%arg0: i32) -> (i32, i32, i32) {
    %c0_i32 = arith.constant 0 : i32
    %c0_i32_0 = arith.constant 0 : i32
    %c0_i32_1 = arith.constant 0 : i32
    return %arg0, %c0_i32, %c0_i32_0 : i32, i32, i32
  }
  func.func @transform_2(%arg0: i32) -> (i32, i32, i32) {
    %c0_i32 = arith.constant 0 : i32
    %c0_i32_0 = arith.constant 0 : i32
    %c0_i32_1 = arith.constant 0 : i32
    %c0_i32_2 = arith.constant 0 : i32
    return %c0_i32, %c0_i32_0, %c0_i32_1 : i32, i32, i32
  }
  func.func @transform_3(%arg0: i32) -> (i32, i32, i32) {
    %c0_i32 = arith.constant 0 : i32
    %c0_i32_0 = arith.constant 0 : i32
    %c0_i32_1 = arith.constant 0 : i32
    return %arg0, %c0_i32, %c0_i32_0 : i32, i32, i32
  }
  func.func @transform_4(%arg0: i32) -> (i32, i32, i32) {
    %c0_i32 = arith.constant 0 : i32
    %c0_i32_0 = arith.constant 0 : i32
    %c0_i32_1 = arith.constant 0 : i32
    return %arg0, %c0_i32, %c0_i32_0 : i32, i32, i32
  }
}

module attributes {stable_mosaic.version = 11 : i64} {
  func.func @_bn_add_relu_kernel(%arg0: i32, %arg1: memref<128x128xbf16, #tpu.memory_space<vmem>>, %arg2: memref<128x128xbf16, #tpu.memory_space<vmem>>, %arg3: memref<1x128xf32, #tpu.memory_space<vmem>>, %arg4: memref<1x128xf32, #tpu.memory_space<vmem>>, %arg5: memref<1x128xf32, #tpu.memory_space<vmem>>, %arg6: memref<1x128xf32, #tpu.memory_space<vmem>>, %arg7: memref<128x128xf32, #tpu.memory_space<vmem>>) attributes {dimension_semantics = [#tpu.dimension_semantics<parallel>], iteration_bounds = array<i64: 1>, scalar_prefetch = 0 : i64, scratch_operands = 0 : i64, tpu.core_type = #tpu.core_type<tc>, window_params = [{transform_indices = @transform_0, window_bounds = array<i64: 128, 128>}, {transform_indices = @transform_1, window_bounds = array<i64: 128, 128>}, {pipeline_mode = #tpu.pipeline_mode<synchronous>, transform_indices = @transform_2, window_bounds = array<i64: 1, 128>}, {pipeline_mode = #tpu.pipeline_mode<synchronous>, transform_indices = @transform_3, window_bounds = array<i64: 1, 128>}, {pipeline_mode = #tpu.pipeline_mode<synchronous>, transform_indices = @transform_4, window_bounds = array<i64: 1, 128>}, {pipeline_mode = #tpu.pipeline_mode<synchronous>, transform_indices = @transform_5, window_bounds = array<i64: 1, 128>}, {transform_indices = @transform_6, window_bounds = array<i64: 128, 128>}]} {
    %c0 = arith.constant 0 : index
    %c0_0 = arith.constant 0 : index
    %0 = vector.load %arg1[%c0, %c0_0] : memref<128x128xbf16, #tpu.memory_space<vmem>>, vector<128x128xbf16>
    %1 = arith.extf %0 : vector<128x128xbf16> to vector<128x128xf32>
    %c0_1 = arith.constant 0 : index
    %c0_2 = arith.constant 0 : index
    %2 = vector.load %arg3[%c0_1, %c0_2] : memref<1x128xf32, #tpu.memory_space<vmem>>, vector<1x128xf32>
    %3 = vector.broadcast %2 : vector<1x128xf32> to vector<128x128xf32>
    %4 = arith.mulf %1, %3 : vector<128x128xf32>
    %c0_3 = arith.constant 0 : index
    %c0_4 = arith.constant 0 : index
    %5 = vector.load %arg4[%c0_3, %c0_4] : memref<1x128xf32, #tpu.memory_space<vmem>>, vector<1x128xf32>
    %6 = vector.broadcast %5 : vector<1x128xf32> to vector<128x128xf32>
    %7 = arith.addf %4, %6 : vector<128x128xf32>
    %cst = arith.constant 0.000000e+00 : f32
    %8 = vector.broadcast %cst : f32 to vector<128x128xf32>
    %9 = arith.maximumf %7, %8 : vector<128x128xf32>
    %c0_5 = arith.constant 0 : index
    %c0_6 = arith.constant 0 : index
    %10 = vector.load %arg2[%c0_5, %c0_6] : memref<128x128xbf16, #tpu.memory_space<vmem>>, vector<128x128xbf16>
    %11 = arith.extf %10 : vector<128x128xbf16> to vector<128x128xf32>
    %c0_7 = arith.constant 0 : index
    %c0_8 = arith.constant 0 : index
    %12 = vector.load %arg5[%c0_7, %c0_8] : memref<1x128xf32, #tpu.memory_space<vmem>>, vector<1x128xf32>
    %13 = vector.broadcast %12 : vector<1x128xf32> to vector<128x128xf32>
    %14 = arith.mulf %11, %13 : vector<128x128xf32>
    %c0_9 = arith.constant 0 : index
    %c0_10 = arith.constant 0 : index
    %15 = vector.load %arg6[%c0_9, %c0_10] : memref<1x128xf32, #tpu.memory_space<vmem>>, vector<1x128xf32>
    %16 = vector.broadcast %15 : vector<1x128xf32> to vector<128x128xf32>
    %17 = arith.addf %14, %16 : vector<128x128xf32>
    %18 = arith.addf %9, %17 : vector<128x128xf32>
    %cst_11 = arith.constant 0.000000e+00 : f32
    %19 = vector.broadcast %cst_11 : f32 to vector<128x128xf32>
    %20 = arith.maximumf %18, %19 : vector<128x128xf32>
    %c0_12 = arith.constant 0 : index
    %c0_13 = arith.constant 0 : index
    %21 = vector.load %arg7[%c0_12, %c0_13] : memref<128x128xf32, #tpu.memory_space<vmem>>, vector<128x128xf32>
    tpu.vector_store %arg7[%c0_12, %c0_13], %20 {strides = array<i32>} : memref<128x128xf32, #tpu.memory_space<vmem>>, vector<128x128xf32>,
    return
  }
  func.func @transform_0(%arg0: i32) -> (i32, i32) {
    %c0_i32 = arith.constant 0 : i32
    %c0_i32_0 = arith.constant 0 : i32
    return %arg0, %c0_i32 : i32, i32
  }
  func.func @transform_1(%arg0: i32) -> (i32, i32) {
    %c0_i32 = arith.constant 0 : i32
    %c0_i32_0 = arith.constant 0 : i32
    return %arg0, %c0_i32 : i32, i32
  }
  func.func @transform_2(%arg0: i32) -> (i32, i32) {
    %c0_i32 = arith.constant 0 : i32
    %c0_i32_0 = arith.constant 0 : i32
    %c0_i32_1 = arith.constant 0 : i32
    return %c0_i32, %c0_i32_0 : i32, i32
  }
  func.func @transform_3(%arg0: i32) -> (i32, i32) {
    %c0_i32 = arith.constant 0 : i32
    %c0_i32_0 = arith.constant 0 : i32
    %c0_i32_1 = arith.constant 0 : i32
    return %c0_i32, %c0_i32_0 : i32, i32
  }
  func.func @transform_4(%arg0: i32) -> (i32, i32) {
    %c0_i32 = arith.constant 0 : i32
    %c0_i32_0 = arith.constant 0 : i32
    %c0_i32_1 = arith.constant 0 : i32
    return %c0_i32, %c0_i32_0 : i32, i32
  }
  func.func @transform_5(%arg0: i32) -> (i32, i32) {
    %c0_i32 = arith.constant 0 : i32
    %c0_i32_0 = arith.constant 0 : i32
    %c0_i32_1 = arith.constant 0 : i32
    return %c0_i32, %c0_i32_0 : i32, i32
  }
  func.func @transform_6(%arg0: i32) -> (i32, i32) {
    %c0_i32 = arith.constant 0 : i32
    %c0_i32_0 = arith.constant 0 : i32
    return %arg0, %c0_i32 : i32, i32
  }
}

module attributes {stable_mosaic.version = 11 : i64} {
  func.func @_dual_matmul_stats_kernel(%arg0: i32, %arg1: memref<128x128xbf16, #tpu.memory_space<vmem>>, %arg2: memref<128x128xbf16, #tpu.memory_space<vmem>>, %arg3: memref<128x128xbf16, #tpu.memory_space<vmem>>, %arg4: memref<128x128xbf16, #tpu.memory_space<vmem>>, %arg5: memref<128x128xbf16, #tpu.memory_space<vmem>>, %arg6: memref<128x128xbf16, #tpu.memory_space<vmem>>, %arg7: memref<1x2x128xf32, #tpu.memory_space<vmem>>, %arg8: memref<1x2x128xf32, #tpu.memory_space<vmem>>) attributes {dimension_semantics = [#tpu.dimension_semantics<parallel>], iteration_bounds = array<i64: 1>, scalar_prefetch = 0 : i64, scratch_operands = 0 : i64, tpu.core_type = #tpu.core_type<tc>, window_params = [{transform_indices = @transform_0, window_bounds = array<i64: 128, 128>}, {transform_indices = @transform_1, window_bounds = array<i64: 128, 128>}, {pipeline_mode = #tpu.pipeline_mode<synchronous>, transform_indices = @transform_2, window_bounds = array<i64: 128, 128>}, {pipeline_mode = #tpu.pipeline_mode<synchronous>, transform_indices = @transform_3, window_bounds = array<i64: 128, 128>}, {transform_indices = @transform_4, window_bounds = array<i64: 128, 128>}, {transform_indices = @transform_5, window_bounds = array<i64: 128, 128>}, {transform_indices = @transform_6, window_bounds = array<i64: 1, 2, 128>}, {transform_indices = @transform_7, window_bounds = array<i64: 1, 2, 128>}]} {
    %c0 = arith.constant 0 : index
    %c0_0 = arith.constant 0 : index
    %0 = vector.load %arg1[%c0, %c0_0] : memref<128x128xbf16, #tpu.memory_space<vmem>>, vector<128x128xbf16>
    %c0_1 = arith.constant 0 : index
    %c0_2 = arith.constant 0 : index
    %1 = vector.load %arg3[%c0_1, %c0_2] : memref<128x128xbf16, #tpu.memory_space<vmem>>, vector<128x128xbf16>
    %cst = arith.constant dense<0.000000e+00> : vector<128x128xf32>
    %2 = tpu.matmul %0, %1, %cst {dimension_numbers = #tpu.dot_dimension_numbers<[1], [0], [0], [1], [0, 0, 1, 1], [], []>} : vector<128x128xbf16>, vector<128x128xbf16>, vector<128x128xf32> -> vector<128x128xf32>
    %c0_3 = arith.constant 0 : index
    %c0_4 = arith.constant 0 : index
    %3 = vector.load %arg2[%c0_3, %c0_4] : memref<128x128xbf16, #tpu.memory_space<vmem>>, vector<128x128xbf16>
    %c0_5 = arith.constant 0 : index
    %c0_6 = arith.constant 0 : index
    %4 = vector.load %arg4[%c0_5, %c0_6] : memref<128x128xbf16, #tpu.memory_space<vmem>>, vector<128x128xbf16>
    %cst_7 = arith.constant dense<0.000000e+00> : vector<128x128xf32>
    %5 = tpu.matmul %3, %4, %cst_7 {dimension_numbers = #tpu.dot_dimension_numbers<[1], [0], [0], [1], [0, 0, 1, 1], [], []>} : vector<128x128xbf16>, vector<128x128xbf16>, vector<128x128xf32> -> vector<128x128xf32>
    %6 = arith.truncf %2 : vector<128x128xf32> to vector<128x128xbf16>
    %c0_8 = arith.constant 0 : index
    %c0_9 = arith.constant 0 : index
    %7 = vector.load %arg5[%c0_8, %c0_9] : memref<128x128xbf16, #tpu.memory_space<vmem>>, vector<128x128xbf16>
    tpu.vector_store %arg5[%c0_8, %c0_9], %6 {strides = array<i32>} : memref<128x128xbf16, #tpu.memory_space<vmem>>, vector<128x128xbf16>,
    %8 = arith.truncf %5 : vector<128x128xf32> to vector<128x128xbf16>
    %c0_10 = arith.constant 0 : index
    %c0_11 = arith.constant 0 : index
    %9 = vector.load %arg6[%c0_10, %c0_11] : memref<128x128xbf16, #tpu.memory_space<vmem>>, vector<128x128xbf16>
    tpu.vector_store %arg6[%c0_10, %c0_11], %8 {strides = array<i32>} : memref<128x128xbf16, #tpu.memory_space<vmem>>, vector<128x128xbf16>,
    %cst_12 = arith.constant dense<0.000000e+00> : vector<128xf32>
    %10 = vector.multi_reduction <add>, %2, %cst_12 [0] : vector<128x128xf32> to vector<128xf32>
    %11 = vector.shape_cast %10 : vector<128xf32> to vector<1x128xf32>
    %12 = arith.mulf %2, %2 : vector<128x128xf32>
    %cst_13 = arith.constant dense<0.000000e+00> : vector<128xf32>
    %13 = vector.multi_reduction <add>, %12, %cst_13 [0] : vector<128x128xf32> to vector<128xf32>
    %14 = vector.shape_cast %13 : vector<128xf32> to vector<1x128xf32>
    %15 = tpu.concatenate %11, %14 in 0 : vector<1x128xf32>, vector<1x128xf32> -> vector<2x128xf32>
    %c0_14 = arith.constant 0 : index
    %c0_15 = arith.constant 0 : index
    %c0_16 = arith.constant 0 : index
    %16 = vector.load %arg7[%c0_14, %c0_15, %c0_16] : memref<1x2x128xf32, #tpu.memory_space<vmem>>, vector<1x2x128xf32>
    %17 = vector.shape_cast %16 : vector<1x2x128xf32> to vector<2x128xf32>
    %18 = vector.shape_cast %15 : vector<2x128xf32> to vector<1x2x128xf32>
    tpu.vector_store %arg7[%c0_14, %c0_15, %c0_16], %18 {strides = array<i32>} : memref<1x2x128xf32, #tpu.memory_space<vmem>>, vector<1x2x128xf32>,
    %cst_17 = arith.constant dense<0.000000e+00> : vector<128xf32>
    %19 = vector.multi_reduction <add>, %5, %cst_17 [0] : vector<128x128xf32> to vector<128xf32>
    %20 = vector.shape_cast %19 : vector<128xf32> to vector<1x128xf32>
    %21 = arith.mulf %5, %5 : vector<128x128xf32>
    %cst_18 = arith.constant dense<0.000000e+00> : vector<128xf32>
    %22 = vector.multi_reduction <add>, %21, %cst_18 [0] : vector<128x128xf32> to vector<128xf32>
    %23 = vector.shape_cast %22 : vector<128xf32> to vector<1x128xf32>
    %24 = tpu.concatenate %20, %23 in 0 : vector<1x128xf32>, vector<1x128xf32> -> vector<2x128xf32>
    %c0_19 = arith.constant 0 : index
    %c0_20 = arith.constant 0 : index
    %c0_21 = arith.constant 0 : index
    %25 = vector.load %arg8[%c0_19, %c0_20, %c0_21] : memref<1x2x128xf32, #tpu.memory_space<vmem>>, vector<1x2x128xf32>
    %26 = vector.shape_cast %25 : vector<1x2x128xf32> to vector<2x128xf32>
    %27 = vector.shape_cast %24 : vector<2x128xf32> to vector<1x2x128xf32>
    tpu.vector_store %arg8[%c0_19, %c0_20, %c0_21], %27 {strides = array<i32>} : memref<1x2x128xf32, #tpu.memory_space<vmem>>, vector<1x2x128xf32>,
    return
  }
  func.func @transform_0(%arg0: i32) -> (i32, i32) {
    %c0_i32 = arith.constant 0 : i32
    %c0_i32_0 = arith.constant 0 : i32
    return %arg0, %c0_i32 : i32, i32
  }
  func.func @transform_1(%arg0: i32) -> (i32, i32) {
    %c0_i32 = arith.constant 0 : i32
    %c0_i32_0 = arith.constant 0 : i32
    return %arg0, %c0_i32 : i32, i32
  }
  func.func @transform_2(%arg0: i32) -> (i32, i32) {
    %c0_i32 = arith.constant 0 : i32
    %c0_i32_0 = arith.constant 0 : i32
    %c0_i32_1 = arith.constant 0 : i32
    return %c0_i32, %c0_i32_0 : i32, i32
  }
  func.func @transform_3(%arg0: i32) -> (i32, i32) {
    %c0_i32 = arith.constant 0 : i32
    %c0_i32_0 = arith.constant 0 : i32
    %c0_i32_1 = arith.constant 0 : i32
    return %c0_i32, %c0_i32_0 : i32, i32
  }
  func.func @transform_4(%arg0: i32) -> (i32, i32) {
    %c0_i32 = arith.constant 0 : i32
    %c0_i32_0 = arith.constant 0 : i32
    return %arg0, %c0_i32 : i32, i32
  }
  func.func @transform_5(%arg0: i32) -> (i32, i32) {
    %c0_i32 = arith.constant 0 : i32
    %c0_i32_0 = arith.constant 0 : i32
    return %arg0, %c0_i32 : i32, i32
  }
  func.func @transform_6(%arg0: i32) -> (i32, i32, i32) {
    %c0_i32 = arith.constant 0 : i32
    %c0_i32_0 = arith.constant 0 : i32
    %c0_i32_1 = arith.constant 0 : i32
    return %arg0, %c0_i32, %c0_i32_0 : i32, i32, i32
  }
  func.func @transform_7(%arg0: i32) -> (i32, i32, i32) {
    %c0_i32 = arith.constant 0 : i32
    %c0_i32_0 = arith.constant 0 : i32
    %c0_i32_1 = arith.constant 0 : i32
    return %arg0, %c0_i32, %c0_i32_0 : i32, i32, i32
  }
}

</mosaic_0001>

<bundles_post_ra>
// kernel: res_bottleneck_block.7
= control target key start
LH: loop header
LB: loop body
LE: loop exit
PB: predicated region body
PF: predicated region fallthrough
CT: control target
= control target key end

     0   :  { %s685_s12 = smov 0   ;;  %s819_s0 = inlined_call_operand.vmem [shape: bf16[512,128], index: 0, kind: input, shape index: {}]   ;;  %s820_s1 = inlined_call_operand.vmem [shape: f32[1,128], index: 1, kind: input, shape index: {}]   ;;  %s821_s2 = inlined_call_operand.vmem [shape: f32[1,128], index: 2, kind: input, shape index: {}]   ;;  %s822_s3 = inlined_call_operand.vmem [shape: bf16[512,128], index: 3, kind: output, shape index: {}]  }
   0x1 LB: > { %s462_s13 = sadd.s32 4294967295, %s663_s12   ;;  %p466_p0 = scmp.ge.s32.totalorder %s663_s12, 1  ;;  %s663_s12 = sphi %s685_s12, %s13_s12  }
   0x2   : > { %p138_p1 = scmp.lt.s32.totalorder %s663_s12, 3 }
   0x4   : > { %p139_p2 = pnand %p466_p0, %p138_p1 }
   0x5   : > { %s467_s14 = sshll.u32 (!%p139_p2), %s462_s13, 5 }
   0x6   : > { %142 = sbr.rel (%p139_p2) target bundleno = 57 (0x39), region = 32  ;;  %p163_p3 = scmp.lt.s32.totalorder (!%p139_p2), %s467_s14, 63 }
   0xb   : > { %s824_s14 = smov (!%p163_p3, %s467_s14), 63  ;;  %v706_v0 = vld [vmem:[%s820_s1] ss:$0 sm:$0xff] }
   0xc   : > { %s468_s15 = sshll.u32 %s824_s14, 2  ;;  %v714_v6 = vld [vmem:[%s821_s2] ss:$0 sm:$0xff] }
   0xd   : > { %s701_s18 = scalar_lea.vmem %s819_s0, %s468_s15  ;;  %s740_s25 = scalar_lea.vmem %s822_s3, %s468_s15 }
   0xe   : > { %v474_v1 = vld [vmem:[%s701_s18] sm:$0xff]   ;;  %v617_v2 = vld [vmem:[%s701_s18 + $0x8] sm:$0xff]   ;;  %v618_v3 = vld [vmem:[%s701_s18 + $0x10] sm:$0xff]  }
   0xf   : > { %v475_v4 = vunpack.c.l.bf16 %v474_v1  ;;  %v476_v5 = vunpack.c.h.bf16 %v474_v1  ;;  %v479_v7 = vunpack.c.l.bf16 %v617_v2  ;;  %v480_v8 = vunpack.c.h.bf16 %v617_v2  ;;  %v619_v9 = vld [vmem:[%s701_s18 + $0x18] sm:$0xff]   ;;  %v620_v30 = vld [vmem:[%s701_s18 + $0x20] sm:$0xff]   ;;  %v621_v35 = vld [vmem:[%s701_s18 + $0x28] sm:$0xff]  }
  0x10   : > { %v483_v10 = vunpack.c.l.bf16 %v618_v3  ;;  %v484_v11 = vunpack.c.h.bf16 %v618_v3  ;;  %v487_v12 = vunpack.c.l.bf16 %v619_v9  ;;  %v488_v13 = vunpack.c.h.bf16 %v619_v9  ;;  %v622_v40 = vld [vmem:[%s701_s18 + $0x30] sm:$0xff]   ;;  %v623_v45 = vld [vmem:[%s701_s18 + $0x38] sm:$0xff]   ;;  %v624_v3 = vld [vmem:[%s701_s18 + $0x40] sm:$0xff]  }
  0x11   : > { %v242_v14 = vmul.f32 %v706_v0, %v475_v4  ;;  %v243_v15 = vmul.f32 %v706_v0, %v476_v5  ;;  %v244_v16 = vmul.f32 %v706_v0, %v479_v7  ;;  %v245_v17 = vmul.f32 %v706_v0, %v480_v8 }
  0x12   : > { %v246_v18 = vmul.f32 %v706_v0, %v483_v10  ;;  %v247_v19 = vmul.f32 %v706_v0, %v484_v11  ;;  %v248_v20 = vmul.f32 %v706_v0, %v487_v12  ;;  %v249_v21 = vmul.f32 %v706_v0, %v488_v13  ;;  %v625_v13 = vld [vmem:[%s701_s18 + $0x48] sm:$0xff]  }
  0x13   : > { %v278_v22 = vadd.f32 %v714_v6, %v242_v14  ;;  %v279_v23 = vadd.f32 %v714_v6, %v243_v15  ;;  %v280_v24 = vadd.f32 %v714_v6, %v244_v16  ;;  %v281_v25 = vadd.f32 %v714_v6, %v245_v17 }
  0x14   : > { %v282_v26 = vadd.f32 %v714_v6, %v246_v18  ;;  %v283_v27 = vadd.f32 %v714_v6, %v247_v19  ;;  %v284_v28 = vadd.f32 %v714_v6, %v248_v20  ;;  %v285_v29 = vadd.f32 %v714_v6, %v249_v21  ;;  %v626_v18 = vld [vmem:[%s701_s18 + $0x50] sm:$0xff]  }
  0x15   : > { %v310_v31 = vmax.f32 %v278_v22, 0.0  ;;  %v311_v32 = vmax.f32 %v279_v23, 0.0  ;;  %v312_v33 = vmax.f32 %v280_v24, 0.0  ;;  %v313_v34 = vmax.f32 %v281_v25, 0.0  ;;  %v627_v23 = vld [vmem:[%s701_s18 + $0x58] sm:$0xff]  }
  0x16   : > { %v314_v36 = vmax.f32 %v282_v26, 0.0  ;;  %v315_v37 = vmax.f32 %v283_v27, 0.0  ;;  %v316_v38 = vmax.f32 %v284_v28, 0.0  ;;  %v317_v39 = vmax.f32 %v285_v29, 0.0 }
  0x17   : > { %v540_v41 = vpack.c.bf16 %v311_v32, %v310_v31  ;;  %v545_v42 = vpack.c.bf16 %v313_v34, %v312_v33  ;;  %v491_v43 = vunpack.c.l.bf16 %v620_v30  ;;  %v492_v44 = vunpack.c.h.bf16 %v620_v30 }
  0x18   : > { %v550_v46 = vpack.c.bf16 %v315_v37, %v314_v36  ;;  %v555_v47 = vpack.c.bf16 %v317_v39, %v316_v38  ;;  %v495_v48 = vunpack.c.l.bf16 %v621_v35  ;;  %v496_v49 = vunpack.c.h.bf16 %v621_v35 }
  0x19   : > { %541 = vst [vmem:[%s740_s25] sm:$0xff] %v540_v41   ;;  %v250_v50 = vmul.f32 %v706_v0, %v491_v43  ;;  %v251_v51 = vmul.f32 %v706_v0, %v492_v44  ;;  %v499_v52 = vunpack.c.l.bf16 %v622_v40  ;;  %v500_v53 = vunpack.c.h.bf16 %v622_v40  ;;  %v628_v40 = vld [vmem:[%s701_s18 + $0x60] sm:$0xff]  }
  0x1a   : > { %632 = vst [vmem:[%s740_s25 + $0x8] sm:$0xff] %v545_v42   ;;  %v252_v54 = vmul.f32 %v706_v0, %v495_v48  ;;  %v253_v55 = vmul.f32 %v706_v0, %v496_v49  ;;  %v503_v56 = vunpack.c.l.bf16 %v623_v45  ;;  %v504_v57 = vunpack.c.h.bf16 %v623_v45 }
  0x1b   : > { %633 = vst [vmem:[%s740_s25 + $0x10] sm:$0xff] %v550_v46   ;;  %v286_v58 = vadd.f32 %v714_v6, %v250_v50  ;;  %v287_v59 = vadd.f32 %v714_v6, %v251_v51  ;;  %v254_v60 = vmul.f32 %v706_v0, %v499_v52  ;;  %v255_v61 = vmul.f32 %v706_v0, %v500_v53  ;;  %v629_v53 = vld [vmem:[%s701_s18 + $0x68] sm:$0xff]  }
  0x1c   : > { %634 = vst [vmem:[%s740_s25 + $0x18] sm:$0xff] %v555_v47   ;;  %v288_v62 = vadd.f32 %v714_v6, %v252_v54  ;;  %v289_v63 = vadd.f32 %v714_v6, %v253_v55  ;;  %v256_v1 = vmul.f32 %v706_v0, %v503_v56  ;;  %v257_v2 = vmul.f32 %v706_v0, %v504_v57 }
  0x1d   : > { %v318_v4 = vmax.f32 %v286_v58, 0.0  ;;  %v319_v5 = vmax.f32 %v287_v59, 0.0  ;;  %v290_v7 = vadd.f32 %v714_v6, %v254_v60  ;;  %v291_v8 = vadd.f32 %v714_v6, %v255_v61  ;;  %v630_v58 = vld [vmem:[%s701_s18 + $0x70] sm:$0xff]  }
  0x1e   : > { %v320_v9 = vmax.f32 %v288_v62, 0.0  ;;  %v321_v10 = vmax.f32 %v289_v63, 0.0  ;;  %v292_v11 = vadd.f32 %v714_v6, %v256_v1  ;;  %v293_v12 = vadd.f32 %v714_v6, %v257_v2  ;;  %v631_v63 = vld [vmem:[%s701_s18 + $0x78] sm:$0xff]  }
  0x1f   : > { %v560_v14 = vpack.c.bf16 %v319_v5, %v318_v4  ;;  %v322_v15 = vmax.f32 %v290_v7, 0.0  ;;  %v323_v16 = vmax.f32 %v291_v8, 0.0  ;;  %v507_v17 = vunpack.c.l.bf16 %v624_v3 }
  0x20   : > { %v565_v19 = vpack.c.bf16 %v321_v10, %v320_v9  ;;  %v324_v20 = vmax.f32 %v292_v11, 0.0  ;;  %v325_v21 = vmax.f32 %v293_v12, 0.0  ;;  %v508_v22 = vunpack.c.h.bf16 %v624_v3 }
  0x21   : > { %635 = vst [vmem:[%s740_s25 + $0x20] sm:$0xff] %v560_v14   ;;  %v570_v24 = vpack.c.bf16 %v323_v16, %v322_v15  ;;  %v258_v25 = vmul.f32 %v706_v0, %v507_v17  ;;  %v511_v26 = vunpack.c.l.bf16 %v625_v13  ;;  %v512_v27 = vunpack.c.h.bf16 %v625_v13 }
  0x22   : > { %636 = vst [vmem:[%s740_s25 + $0x28] sm:$0xff] %v565_v19   ;;  %v575_v28 = vpack.c.bf16 %v325_v21, %v324_v20  ;;  %v259_v29 = vmul.f32 %v706_v0, %v508_v22  ;;  %v515_v30 = vunpack.c.l.bf16 %v626_v18  ;;  %v516_v31 = vunpack.c.h.bf16 %v626_v18 }
  0x23   : > { %637 = vst [vmem:[%s740_s25 + $0x30] sm:$0xff] %v570_v24   ;;  %v294_v32 = vadd.f32 %v714_v6, %v258_v25  ;;  %v260_v33 = vmul.f32 %v706_v0, %v511_v26  ;;  %v261_v34 = vmul.f32 %v706_v0, %v512_v27  ;;  %v519_v35 = vunpack.c.l.bf16 %v627_v23 }
  0x24   : > { %638 = vst [vmem:[%s740_s25 + $0x38] sm:$0xff] %v575_v28   ;;  %v295_v36 = vadd.f32 %v714_v6, %v259_v29  ;;  %v262_v37 = vmul.f32 %v706_v0, %v515_v30  ;;  %v263_v38 = vmul.f32 %v706_v0, %v516_v31  ;;  %v520_v39 = vunpack.c.h.bf16 %v627_v23 }
  0x25   : > { %v326_v41 = vmax.f32 %v294_v32, 0.0  ;;  %v296_v42 = vadd.f32 %v714_v6, %v260_v33  ;;  %v297_v43 = vadd.f32 %v714_v6, %v261_v34  ;;  %v264_v44 = vmul.f32 %v706_v0, %v519_v35 }
  0x26   : > { %v327_v45 = vmax.f32 %v295_v36, 0.0  ;;  %v298_v46 = vadd.f32 %v714_v6, %v262_v37  ;;  %v299_v47 = vadd.f32 %v714_v6, %v263_v38  ;;  %v265_v48 = vmul.f32 %v706_v0, %v520_v39 }
  0x27   : > { %v328_v49 = vmax.f32 %v296_v42, 0.0  ;;  %v329_v50 = vmax.f32 %v297_v43, 0.0  ;;  %v300_v51 = vadd.f32 %v714_v6, %v264_v44  ;;  %v523_v52 = vunpack.c.l.bf16 %v628_v40 }
  0x28   : > { %v580_v54 = vpack.c.bf16 %v327_v45, %v326_v41  ;;  %v330_v55 = vmax.f32 %v298_v46, 0.0  ;;  %v331_v56 = vmax.f32 %v299_v47, 0.0  ;;  %v301_v57 = vadd.f32 %v714_v6, %v265_v48 }
  0x29   : > { %v585_v59 = vpack.c.bf16 %v329_v50, %v328_v49  ;;  %v332_v60 = vmax.f32 %v300_v51, 0.0  ;;  %v524_v61 = vunpack.c.h.bf16 %v628_v40  ;;  %v266_v62 = vmul.f32 %v706_v0, %v523_v52 }
  0x2a   : > { %639 = vst [vmem:[%s740_s25 + $0x40] sm:$0xff] %v580_v54   ;;  %v590_v1 = vpack.c.bf16 %v331_v56, %v330_v55  ;;  %v333_v2 = vmax.f32 %v301_v57, 0.0  ;;  %v527_v3 = vunpack.c.l.bf16 %v629_v53  ;;  %v528_v4 = vunpack.c.h.bf16 %v629_v53 }
  0x2b   : > { %640 = vst [vmem:[%s740_s25 + $0x48] sm:$0xff] %v585_v59   ;;  %v267_v5 = vmul.f32 %v706_v0, %v524_v61  ;;  %v302_v7 = vadd.f32 %v714_v6, %v266_v62  ;;  %v531_v8 = vunpack.c.l.bf16 %v630_v58  ;;  %v532_v9 = vunpack.c.h.bf16 %v630_v58 }
  0x2c   : > { %641 = vst [vmem:[%s740_s25 + $0x50] sm:$0xff] %v590_v1   ;;  %v595_v10 = vpack.c.bf16 %v333_v2, %v332_v60  ;;  %v268_v11 = vmul.f32 %v706_v0, %v527_v3  ;;  %v269_v12 = vmul.f32 %v706_v0, %v528_v4  ;;  %v535_v13 = vunpack.c.l.bf16 %v631_v63 }
  0x2d   : > { %v303_v14 = vadd.f32 %v714_v6, %v267_v5  ;;  %v334_v15 = vmax.f32 %v302_v7, 0.0  ;;  %v270_v16 = vmul.f32 %v706_v0, %v531_v8  ;;  %v271_v17 = vmul.f32 %v706_v0, %v532_v9 }
  0x2e   : > { %642 = vst [vmem:[%s740_s25 + $0x58] sm:$0xff] %v595_v10   ;;  %v304_v18 = vadd.f32 %v714_v6, %v268_v11  ;;  %v305_v19 = vadd.f32 %v714_v6, %v269_v12  ;;  %v536_v20 = vunpack.c.h.bf16 %v631_v63  ;;  %v272_v21 = vmul.f32 %v706_v0, %v535_v13 }
  0x2f   : > { %v335_v22 = vmax.f32 %v303_v14, 0.0  ;;  %v306_v23 = vadd.f32 %v714_v6, %v270_v16  ;;  %v307_v24 = vadd.f32 %v714_v6, %v271_v17 }
  0x30   : > { %v336_v25 = vmax.f32 %v304_v18, 0.0  ;;  %v337_v26 = vmax.f32 %v305_v19, 0.0  ;;  %v273_v27 = vmul.f32 %v706_v0, %v536_v20  ;;  %v308_v28 = vadd.f32 %v714_v6, %v272_v21 }
  0x31   : > { %v600_v29 = vpack.c.bf16 %v335_v22, %v334_v15  ;;  %v338_v30 = vmax.f32 %v306_v23, 0.0  ;;  %v339_v31 = vmax.f32 %v307_v24, 0.0 }
  0x32   : > { %v605_v32 = vpack.c.bf16 %v337_v26, %v336_v25  ;;  %v309_v33 = vadd.f32 %v714_v6, %v273_v27  ;;  %v340_v34 = vmax.f32 %v308_v28, 0.0 }
  0x33   : > { %643 = vst [vmem:[%s740_s25 + $0x60] sm:$0xff] %v600_v29   ;;  %v610_v35 = vpack.c.bf16 %v339_v31, %v338_v30 }
  0x34   : > { %644 = vst [vmem:[%s740_s25 + $0x68] sm:$0xff] %v605_v32   ;;  %v341_v36 = vmax.f32 %v309_v33, 0.0 }
  0x35   : > { %645 = vst [vmem:[%s740_s25 + $0x70] sm:$0xff] %v610_v35  }
  0x36   : > { %v615_v37 = vpack.c.bf16 %v341_v36, %v340_v34 }
  0x38   : > { %646 = vst [vmem:[%s740_s25 + $0x78] sm:$0xff] %v615_v37  }
  0x39 PF: > { %s13_s12 = sadd.s32 1, %s663_s12  }
  0x3a   : > { %p10_p4 = scmp.ge.s32.totalorder %s13_s12, 4  }
  0x3c   :  { %12 = sbr.rel (!%p10_p4) target bundleno = 1 (0x1), region = 62 }

// kernel: res_bottleneck_block.6
= control target key start
LH: loop header
LB: loop body
LE: loop exit
PB: predicated region body
PF: predicated region fallthrough
CT: control target
= control target key end

     0   :  { %s1013_s12 = smov 0   ;;  %s1219_s0 = inlined_call_operand.vmem [shape: bf16[512,128], index: 0, kind: input, shape index: {}]   ;;  %s1220_s1 = inlined_call_operand.vmem [shape: bf16[128,128], index: 1, kind: input, shape index: {}]   ;;  %s1221_s2 = inlined_call_operand.vmem [shape: bf16[512,128], index: 2, kind: output, shape index: {0}]   ;;  %s1222_s3 = inlined_call_operand.vmem [shape: f32[2,2,128], index: 3, kind: output, shape index: {1}]  }
   0x1 LB: > { %s1019_s13 = sadd.s32 4294967295, %s991_s12   ;;  %p730_p0 = scmp.ge.s32.totalorder %s991_s12, 1  ;;  %s991_s12 = sphi %s1013_s12, %s14_s12  }
   0x2   : > { %p141_p1 = scmp.lt.s32.totalorder %s991_s12, 3 }
   0x4   : > { %p142_p2 = pnand %p730_p0, %p141_p1 }
   0x5   : > { %s731_s22 = sshll.u32 (!%p142_p2), %s1019_s13, 5  ;;  %p181_p4 = scmp.lt.s32.totalorder (!%p142_p2), %s1019_s13, 1 }
   0x6   : > { %145 = sbr.rel (%p142_p2) target bundleno = 291 (0x123), region = 28  ;;  %p170_p3 = scmp.lt.s32.totalorder (!%p142_p2), %s731_s22, 63 }
   0xb   : > { %v857_v0 = vld [vmem:[%s1220_s1 + $0x38] sm:$0xff]  ;;  %v856_v1 = vld [vmem:[%s1220_s1 + $0x30] sm:$0xff]  ;;  %v855_v2 = vld [vmem:[%s1220_s1 + $0x28] sm:$0xff]  ;;  %s1224_s22 = smov (!%p170_p3, %s731_s22), 63  ;;  %s1226_s13 = smov (!%p181_p4, %s1019_s13), 1  ;;  %vm636_vm0 = vcmask 1040384  }
   0xc   : > { %377 = vmatpush.bf16.msra.mxu0 %v857_v0  ;;  %953 = vmatpush.bf16.msra.mxu1 %v857_v0  ;;  %v854_v3 = vld [vmem:[%s1220_s1 + $0x20] sm:$0xff]  ;;  %v853_v4 = vld [vmem:[%s1220_s1 + $0x18] sm:$0xff]  ;;  %v852_v5 = vld [vmem:[%s1220_s1 + $0x10] sm:$0xff]  ;;  %s732_s29 = sshll.u32 %s1224_s22, 2  ;;  %s735_s11 = sshll.u32 %s1226_s13, 1 }
   0xd   : > { %954 = vmatpush.bf16.msra.mxu2 %v857_v0  ;;  %955 = vmatpush.bf16.msra.mxu3 %v857_v0  ;;  %v851_v6 = vld [vmem:[%s1220_s1 + $0x8] sm:$0xff]  ;;  %v850_v7 = vld [vmem:[%s1220_s1] sm:$0xff]  ;;  %s1056_s7 = scalar_lea.vmem %s1219_s0, %s732_s29  ;;  %s1083_s10 = scalar_lea.vmem %s1221_s2, %s732_s29 }
   0xe   : > { %v834_v8 = vld [vmem:[%s1056_s7] sm:$0xff]  ;;  %v835_v12 = vld [vmem:[%s1056_s7 + $0x8] sm:$0xff]  ;;  %v836_v16 = vld [vmem:[%s1056_s7 + $0x10] sm:$0xff]  ;;  %s184_s16 = scalar_lea.vmem %s1222_s3, %s735_s11 }
   0xf   : > { %v838_v9 = vld [vmem:[%s1056_s7 + $0x20] sm:$0xff]  ;;  %v839_v13 = vld [vmem:[%s1056_s7 + $0x28] sm:$0xff]  ;;  %v840_v17 = vld [vmem:[%s1056_s7 + $0x30] sm:$0xff] }
  0x10   : > { %378 = vmatpush.bf16.msra.mxu0 %v856_v1  ;;  %956 = vmatpush.bf16.msra.mxu1 %v856_v1  ;;  %v842_v10 = vld [vmem:[%s1056_s7 + $0x40] sm:$0xff]  ;;  %v843_v14 = vld [vmem:[%s1056_s7 + $0x48] sm:$0xff]  ;;  %v844_v18 = vld [vmem:[%s1056_s7 + $0x50] sm:$0xff] }
  0x11   : > { %957 = vmatpush.bf16.msra.mxu2 %v856_v1  ;;  %958 = vmatpush.bf16.msra.mxu3 %v856_v1  ;;  %v846_v11 = vld [vmem:[%s1056_s7 + $0x60] sm:$0xff]  ;;  %v847_v15 = vld [vmem:[%s1056_s7 + $0x68] sm:$0xff]  ;;  %v848_v19 = vld [vmem:[%s1056_s7 + $0x70] sm:$0xff] }
  0x12   : > { %v837_v20 = vld [vmem:[%s1056_s7 + $0x18] sm:$0xff] }
  0x13   : > { %v841_v21 = vld [vmem:[%s1056_s7 + $0x38] sm:$0xff] }
  0x14   : > { %379 = vmatpush.bf16.msra.mxu0 %v855_v2  ;;  %959 = vmatpush.bf16.msra.mxu1 %v855_v2  ;;  %v845_v22 = vld [vmem:[%s1056_s7 + $0x58] sm:$0xff] }
  0x15   : > { %960 = vmatpush.bf16.msra.mxu2 %v855_v2  ;;  %961 = vmatpush.bf16.msra.mxu3 %v855_v2  ;;  %v849_v23 = vld [vmem:[%s1056_s7 + $0x78] sm:$0xff] }
  0x18   : > { %380 = vmatpush.bf16.msra.mxu0 %v854_v3  ;;  %962 = vmatpush.bf16.msra.mxu1 %v854_v3 }
  0x19   : > { %963 = vmatpush.bf16.msra.mxu2 %v854_v3  ;;  %964 = vmatpush.bf16.msra.mxu3 %v854_v3 }
  0x1c   : > { %381 = vmatpush.bf16.msra.mxu0 %v853_v4  ;;  %965 = vmatpush.bf16.msra.mxu1 %v853_v4 }
  0x1d   : > { %966 = vmatpush.bf16.msra.mxu2 %v853_v4  ;;  %967 = vmatpush.bf16.msra.mxu3 %v853_v4 }
  0x20   : > { %382 = vmatpush.bf16.msra.mxu0 %v852_v5  ;;  %968 = vmatpush.bf16.msra.mxu1 %v852_v5 }
  0x21   : > { %969 = vmatpush.bf16.msra.mxu2 %v852_v5  ;;  %970 = vmatpush.bf16.msra.mxu3 %v852_v5 }
  0x24   : > { %383 = vmatpush.bf16.msra.mxu0 %v851_v6  ;;  %971 = vmatpush.bf16.msra.mxu1 %v851_v6 }
  0x25   : > { %972 = vmatpush.bf16.msra.mxu2 %v851_v6  ;;  %973 = vmatpush.bf16.msra.mxu3 %v851_v6 }
  0x28   : > { %384 = vmatpush.bf16.msra.mxu0 %v850_v7  ;;  %974 = vmatpush.bf16.msra.mxu1 %v850_v7 }
  0x29   : > { %975 = vmatpush.bf16.msra.mxu2 %v850_v7  ;;  %976 = vmatpush.bf16.msra.mxu3 %v850_v7 }
  0x2b   : > { %385 = vmatmul.bf16.vlgmr.msra.gmra.mxu0 %v834_v8  ;;  %405 = vmatmul.bf16.vlgmr.msra.gmra.mxu1 %v838_v9 }
  0x2c   : > { %425 = vmatmul.bf16.vlgmr.msra.gmra.mxu2 %v842_v10  ;;  %445 = vmatmul.bf16.vlgmr.msra.gmra.mxu3 %v846_v11 }
  0x3b   : > { %390 = vmatmul.bf16.gmra.mxu0 %v835_v12  ;;  %410 = vmatmul.bf16.gmra.mxu1 %v839_v13 }
  0x3c   : > { %430 = vmatmul.bf16.gmra.mxu2 %v843_v14  ;;  %450 = vmatmul.bf16.gmra.mxu3 %v847_v15 }
  0x4b   : > { %395 = vmatmul.bf16.gmra.mxu0 %v836_v16  ;;  %415 = vmatmul.bf16.gmra.mxu1 %v840_v17 }
  0x4c   : > { %435 = vmatmul.bf16.gmra.mxu2 %v844_v18  ;;  %455 = vmatmul.bf16.gmra.mxu3 %v848_v19 }
  0x5b   : > { %400 = vmatmul.bf16.gmra.mxu0 %v837_v20  ;;  %420 = vmatmul.bf16.gmra.mxu1 %v841_v21 }
  0x5c   : > { %440 = vmatmul.bf16.gmra.mxu2 %v845_v22  ;;  %460 = vmatmul.bf16.gmra.mxu3 %v849_v23 }
  0xa8   : > { %v386_v24 = vpop.f32.mrf.mxu0  ;;  %v1074_v25 = vpop.f32.mrf.mxu1 }
  0xa9   : > { %v567_v57 = vmul.f32 %v386_v24, %v386_v24 }
  0xaf   : > { %v1076_v26 = vpop.f32.mrf.mxu2  ;;  %v1089_v31 = vpop.f32.mrf.mxu3 }
  0xb0   : > { %v388_v27 = vpop.f32.mrf.mxu0  ;;  %v1085_v28 = vpop.f32.mrf.mxu1 }
  0xb1   : > { %v861_v29 = vpack.c.bf16 %v388_v27, %v386_v24  ;;  %v881_v30 = vpack.c.bf16 %v1085_v28, %v1074_v25  ;;  %v568_v56 = vmul.f32 %v388_v27, %v388_v27  ;;  %v530_v59 = vadd.f32 %v388_v27, %v386_v24 }
  0xb2   : > { %v575_v27 = vmul.f32 %v1074_v25, %v1074_v25 }
  0xb3   : > { %862 = vst [vmem:[%s1083_s10] sm:$0xff] %v861_v29   ;;  %v599_v60 = vadd.f32 %v568_v56, %v567_v57 }
  0xb4   : > { %941 = vst [vmem:[%s1083_s10 + $0x20] sm:$0xff] %v881_v30  }
  0xb7   : > { %v1093_v32 = vpop.f32.mrf.mxu2  ;;  %v1099_v36 = vpop.f32.mrf.mxu3 }
  0xb8   : > { %v391_v33 = vpop.f32.mrf.mxu0  ;;  %v1095_v34 = vpop.f32.mrf.mxu1  ;;  %v901_v35 = vpack.c.bf16 %v1093_v32, %v1076_v26  ;;  %v921_v37 = vpack.c.bf16 %v1099_v36, %v1089_v31 }
  0xb9   : > { %v569_v58 = vmul.f32 %v391_v33, %v391_v33  ;;  %v531_v62 = vadd.f32 %v530_v59, %v391_v33 }
  0xba   : > { %945 = vst [vmem:[%s1083_s10 + $0x40] sm:$0xff] %v901_v35  }
  0xbb   : > { %949 = vst [vmem:[%s1083_s10 + $0x60] sm:$0xff] %v921_v37   ;;  %v600_v0 = vadd.f32 %v599_v60, %v569_v58 }
  0xbf   : > { %v1105_v38 = vpop.f32.mrf.mxu2  ;;  %v1111_v43 = vpop.f32.mrf.mxu3 }
  0xc0   : > { %v393_v39 = vpop.f32.mrf.mxu0  ;;  %v1107_v40 = vpop.f32.mrf.mxu1 }
  0xc1   : > { %v866_v41 = vpack.c.bf16 %v393_v39, %v391_v33  ;;  %v886_v42 = vpack.c.bf16 %v1107_v40, %v1095_v34  ;;  %v570_v61 = vmul.f32 %v393_v39, %v393_v39  ;;  %v532_v5 = vadd.f32 %v531_v62, %v393_v39 }
  0xc2   : > { %v576_v33 = vmul.f32 %v1085_v28, %v1085_v28  ;;  %v577_v39 = vmul.f32 %v1095_v34, %v1095_v34 }
  0xc3   : > { %938 = vst [vmem:[%s1083_s10 + $0x8] sm:$0xff] %v866_v41   ;;  %v601_v7 = vadd.f32 %v600_v0, %v570_v61 }
  0xc4   : > { %942 = vst [vmem:[%s1083_s10 + $0x28] sm:$0xff] %v886_v42  }
  0xc7   : > { %v1115_v44 = vpop.f32.mrf.mxu2  ;;  %v1121_v48 = vpop.f32.mrf.mxu3 }
  0xc8   : > { %v396_v45 = vpop.f32.mrf.mxu0  ;;  %v1117_v46 = vpop.f32.mrf.mxu1  ;;  %v906_v47 = vpack.c.bf16 %v1115_v44, %v1105_v38  ;;  %v926_v49 = vpack.c.bf16 %v1121_v48, %v1111_v43 }
  0xc9   : > { %v571_v1 = vmul.f32 %v396_v45, %v396_v45  ;;  %v533_v10 = vadd.f32 %v532_v5, %v396_v45  ;;  %v584_v5 = vmul.f32 %v1093_v32, %v1093_v32 }
  0xca   : > { %946 = vst [vmem:[%s1083_s10 + $0x48] sm:$0xff] %v906_v47  }
  0xcb   : > { %950 = vst [vmem:[%s1083_s10 + $0x68] sm:$0xff] %v926_v49   ;;  %v602_v11 = vadd.f32 %v601_v7, %v571_v1 }
  0xcf   : > { %v1127_v50 = vpop.f32.mrf.mxu2  ;;  %v1133_v55 = vpop.f32.mrf.mxu3 }
  0xd0   : > { %v398_v51 = vpop.f32.mrf.mxu0  ;;  %v1129_v52 = vpop.f32.mrf.mxu1 }
  0xd1   : > { %v871_v53 = vpack.c.bf16 %v398_v51, %v396_v45  ;;  %v891_v54 = vpack.c.bf16 %v1129_v52, %v1117_v46  ;;  %v572_v8 = vmul.f32 %v398_v51, %v398_v51  ;;  %v534_v13 = vadd.f32 %v533_v10, %v398_v51 }
  0xd2   : > { %v586_v10 = vmul.f32 %v1115_v44, %v1115_v44 }
  0xd3   : > { %939 = vst [vmem:[%s1083_s10 + $0x10] sm:$0xff] %v871_v53   ;;  %v603_v14 = vadd.f32 %v602_v11, %v572_v8 }
  0xd4   : > { %943 = vst [vmem:[%s1083_s10 + $0x30] sm:$0xff] %v891_v54   ;;  %v579_v54 = vmul.f32 %v1117_v46, %v1117_v46 }
  0xd7   : > { %v1137_v63 = vpop.f32.mrf.mxu2  ;;  %v1141_v6 = vpop.f32.mrf.mxu3 }
  0xd8   : > { %v401_v2 = vpop.f32.mrf.mxu0  ;;  %v421_v3 = vpop.f32.mrf.mxu1  ;;  %v911_v4 = vpack.c.bf16 %v1137_v63, %v1127_v50  ;;  %v931_v9 = vpack.c.bf16 %v1141_v6, %v1133_v55 }
  0xd9   : > { %v573_v12 = vmul.f32 %v401_v2, %v401_v2  ;;  %v535_v15 = vadd.f32 %v534_v13, %v401_v2  ;;  %v581_v61 = vmul.f32 %v421_v3, %v421_v3 }
  0xda   : > { %947 = vst [vmem:[%s1083_s10 + $0x50] sm:$0xff] %v911_v4  }
  0xdb   : > { %951 = vst [vmem:[%s1083_s10 + $0x70] sm:$0xff] %v931_v9   ;;  %v604_v17 = vadd.f32 %v603_v14, %v573_v12 }
  0xdf   : > { %v441_v16 = vpop.f32.mrf.mxu2  ;;  %v1147_v24 = vpop.f32.mrf.mxu3 }
  0xe0   : > { %v403_v18 = vpop.f32.mrf.mxu0  ;;  %v423_v19 = vpop.f32.mrf.mxu1 }
  0xe1   : > { %v876_v20 = vpack.c.bf16 %v403_v18, %v401_v2  ;;  %v536_v21 = vadd.f32 %v535_v15, %v403_v18  ;;  %v574_v22 = vmul.f32 %v403_v18, %v403_v18  ;;  %v896_v23 = vpack.c.bf16 %v423_v19, %v421_v3 }
  0xe2   : > { %v582_v1 = vmul.f32 %v423_v19, %v423_v19  ;;  %v583_v2 = vmul.f32 %v1076_v26, %v1076_v26  ;;  %v588_v15 = vmul.f32 %v1137_v63, %v1137_v63 }
  0xe3   : > { %940 = vst [vmem:[%s1083_s10 + $0x18] sm:$0xff] %v876_v20   ;;  %v537_v29 = vadd.f32 %v536_v21, %v1074_v25  ;;  %v605_v30 = vadd.f32 %v604_v17, %v574_v22  ;;  %v578_v25 = vmul.f32 %v1107_v40, %v1107_v40 }
  0xe4   : > { %944 = vst [vmem:[%s1083_s10 + $0x38] sm:$0xff] %v896_v23  }
  0xe5   : > { %v538_v35 = vadd.f32 %v537_v29, %v1085_v28  ;;  %v606_v37 = vadd.f32 %v605_v30, %v575_v27 }
  0xe7   : > { %v539_v41 = vadd.f32 %v538_v35, %v1095_v34  ;;  %v607_v42 = vadd.f32 %v606_v37, %v576_v33  ;;  %v443_v45 = vpop.f32.mrf.mxu2  ;;  %v463_v53 = vpop.f32.mrf.mxu3  ;;  %v580_v34 = vmul.f32 %v1129_v52, %v1129_v52  ;;  %v594_v35 = vmul.f32 %v1121_v48, %v1121_v48 }
  0xe8   : > { %v916_v47 = vpack.c.bf16 %v443_v45, %v441_v16  ;;  %v936_v28 = vpack.c.bf16 %v463_v53, %v1147_v24  ;;  %v590_v22 = vmul.f32 %v443_v45, %v443_v45 }
  0xe9   : > { %v608_v49 = vadd.f32 %v607_v42, %v577_v39  ;;  %v540_v51 = vadd.f32 %v539_v41, %v1107_v40  ;;  %v595_v39 = vmul.f32 %v1133_v55, %v1133_v55 }
  0xea   : > { %948 = vst [vmem:[%s1083_s10 + $0x58] sm:$0xff] %v916_v47  }
  0xeb   : > { %v541_v56 = vadd.f32 %v540_v51, %v1117_v46  ;;  %v609_v57 = vadd.f32 %v608_v49, %v578_v25  ;;  %952 = vst [vmem:[%s1083_s10 + $0x78] sm:$0xff] %v936_v28   ;;  %v597_v49 = vmul.f32 %v1147_v24, %v1147_v24  ;;  %v598_v28 = vmul.f32 %v463_v53, %v463_v53 }
  0xed   : > { %v542_v58 = vadd.f32 %v541_v56, %v1129_v52  ;;  %v610_v59 = vadd.f32 %v609_v57, %v579_v54  ;;  %v585_v52 = vmul.f32 %v1105_v38, %v1105_v38 }
  0xef   : > { %v543_v60 = vadd.f32 %v542_v58, %v421_v3  ;;  %v611_v40 = vadd.f32 %v610_v59, %v580_v34 }
  0xf1   : > { %v612_v62 = vadd.f32 %v611_v40, %v581_v61  ;;  %v544_v0 = vadd.f32 %v543_v60, %v423_v19  ;;  %v589_v19 = vmul.f32 %v441_v16, %v441_v16 }
  0xf3   : > { %v545_v4 = vadd.f32 %v544_v0, %v1076_v26  ;;  %v613_v46 = vadd.f32 %v612_v62, %v582_v1  ;;  %v587_v26 = vmul.f32 %v1127_v50, %v1127_v50 }
  0xf5   : > { %v546_v7 = vadd.f32 %v545_v4, %v1093_v32  ;;  %v614_v8 = vadd.f32 %v613_v46, %v583_v2 }
  0xf7   : > { %v547_v3 = vadd.f32 %v546_v7, %v1105_v38  ;;  %v615_v9 = vadd.f32 %v614_v8, %v584_v5 }
  0xf9   : > { %v616_v11 = vadd.f32 %v615_v9, %v585_v52  ;;  %v548_v12 = vadd.f32 %v547_v3, %v1115_v44  ;;  %v591_v44 = vmul.f32 %v1089_v31, %v1089_v31 }
  0xfb   : > { %v549_v13 = vadd.f32 %v548_v12, %v1127_v50  ;;  %v617_v14 = vadd.f32 %v616_v11, %v586_v10  ;;  %v592_v50 = vmul.f32 %v1099_v36, %v1099_v36 }
  0xfd   : > { %v550_v32 = vadd.f32 %v549_v13, %v1137_v63  ;;  %v618_v17 = vadd.f32 %v617_v14, %v587_v26  ;;  %v593_v63 = vmul.f32 %v1111_v43, %v1111_v43 }
  0xff   : > { %v619_v38 = vadd.f32 %v618_v17, %v588_v15  ;;  %v551_v18 = vadd.f32 %v550_v32, %v441_v16 }
 0x101   : > { %v620_v20 = vadd.f32 %v619_v38, %v589_v19  ;;  %v552_v21 = vadd.f32 %v551_v18, %v443_v45 }
 0x103   : > { %v553_v23 = vadd.f32 %v552_v21, %v1089_v31  ;;  %v621_v27 = vadd.f32 %v620_v20, %v590_v22 }
 0x105   : > { %v554_v29 = vadd.f32 %v553_v23, %v1099_v36  ;;  %v622_v30 = vadd.f32 %v621_v27, %v591_v44 }
 0x107   : > { %v555_v16 = vadd.f32 %v554_v29, %v1111_v43  ;;  %v623_v33 = vadd.f32 %v622_v30, %v592_v50  ;;  %v596_v43 = vmul.f32 %v1141_v6, %v1141_v6 }
 0x109   : > { %v624_v37 = vadd.f32 %v623_v33, %v593_v63  ;;  %v556_v31 = vadd.f32 %v555_v16, %v1121_v48 }
 0x10b   : > { %v557_v41 = vadd.f32 %v556_v31, %v1133_v55  ;;  %v625_v36 = vadd.f32 %v624_v37, %v594_v35 }
 0x10d   : > { %v558_v42 = vadd.f32 %v557_v41, %v1141_v6  ;;  %v626_v45 = vadd.f32 %v625_v36, %v595_v39 }
 0x10f   : > { %v627_v47 = vadd.f32 %v626_v45, %v596_v43  ;;  %v559_v25 = vadd.f32 %v558_v42, %v1147_v24 }
 0x111   : > { %v628_v48 = vadd.f32 %v627_v47, %v597_v49  ;;  %v560_v51 = vadd.f32 %v559_v25, %v463_v53 }
 0x113   : > { %v561_v54 = vrot.slane %v560_v51, 4  ;;  %v629_v56 = vadd.f32 %v628_v48, %v598_v28 }
 0x115   : > { %v562_v55 = vadd.f32 %v561_v54, %v560_v51  ;;  %v630_v57 = vrot.slane %v629_v56, 4 }
 0x117   : > { %v563_v34 = vrot.slane %v562_v55, 2  ;;  %v631_v58 = vadd.f32 %v630_v57, %v629_v56 }
 0x119   : > { %v564_v59 = vadd.f32 %v563_v34, %v562_v55  ;;  %v632_v6 = vrot.slane %v631_v58, 2 }
 0x11b   : > { %v565_v60 = vrot.slane %v564_v59, 1  ;;  %v633_v61 = vadd.f32 %v632_v6, %v631_v58 }
 0x11d   : > { %v634_v40 = vrot.slane %v633_v61, 1  ;;  %v566_v24 = vadd.f32 %v565_v60, %v564_v59 }
 0x11f   : > { %v635_v53 = vadd.f32 %v634_v40, %v633_v61 }
 0x121   : > { %v637_v62 = vsel %vm636_vm0, %v566_v24, %v635_v53 }
 0x122   : > { %638 = vst [vmem:[%s184_s16] sm:$0x3] %v637_v62 }
 0x123 PF: > { %s14_s12 = sadd.s32 1, %s991_s12  }
 0x124   : > { %p11_p5 = scmp.ge.s32.totalorder %s14_s12, 4  }
 0x126   :  { %13 = sbr.rel (!%p11_p5) target bundleno = 1 (0x1), region = 70 }

// kernel: res_bottleneck_block.9
= control target key start
LH: loop header
LB: loop body
LE: loop exit
PB: predicated region body
PF: predicated region fallthrough
CT: control target
= control target key end

     0   :  { %s336_s0 = inlined_call_operand.vmem [shape: bf16[128,128], index: 0, kind: input, shape index: {}]   ;;  %s337_s1 = inlined_call_operand.vmem [shape: f32[1,128], index: 1, kind: input, shape index: {}]   ;;  %s338_s2 = inlined_call_operand.vmem [shape: f32[1,128], index: 2, kind: input, shape index: {}]   ;;  %s339_s3 = inlined_call_operand.vmem [shape: bf16[128,128], index: 3, kind: output, shape index: {}]  }
   0x1   :  { %v139_v0 = vld [vmem:[%s336_s0] sm:$0xff]   ;;  %v210_v5 = vld [vmem:[%s336_s0 + $0x8] sm:$0xff]   ;;  %v211_v8 = vld [vmem:[%s336_s0 + $0x10] sm:$0xff]  }
   0x2   :  { %v252_v1 = vld [vmem:[%s337_s1] ss:$0 sm:$0xff]  ;;  %v140_v2 = vunpack.c.l.bf16 %v139_v0  ;;  %v141_v3 = vunpack.c.h.bf16 %v139_v0  ;;  %v144_v6 = vunpack.c.l.bf16 %v210_v5  ;;  %v145_v7 = vunpack.c.h.bf16 %v210_v5  ;;  %v212_v9 = vld [vmem:[%s336_s0 + $0x18] sm:$0xff]   ;;  %v214_v35 = vld [vmem:[%s336_s0 + $0x28] sm:$0xff]  }
   0x3   :  { %v257_v4 = vld [vmem:[%s338_s2] ss:$0 sm:$0xff]  ;;  %v148_v12 = vunpack.c.l.bf16 %v211_v8  ;;  %v149_v13 = vunpack.c.h.bf16 %v211_v8  ;;  %v152_v16 = vunpack.c.l.bf16 %v212_v9  ;;  %v153_v17 = vunpack.c.h.bf16 %v212_v9  ;;  %v215_v40 = vld [vmem:[%s336_s0 + $0x30] sm:$0xff]   ;;  %v216_v45 = vld [vmem:[%s336_s0 + $0x38] sm:$0xff]  }
   0x4   :  { %v50_v10 = vmul.f32 %v252_v1, %v140_v2  ;;  %v51_v11 = vmul.f32 %v252_v1, %v141_v3  ;;  %v52_v14 = vmul.f32 %v252_v1, %v144_v6  ;;  %v53_v15 = vmul.f32 %v252_v1, %v145_v7  ;;  %v213_v26 = vld [vmem:[%s336_s0 + $0x20] sm:$0xff]  }
   0x5   :  { %v54_v20 = vmul.f32 %v252_v1, %v148_v12  ;;  %v55_v21 = vmul.f32 %v252_v1, %v149_v13  ;;  %v56_v24 = vmul.f32 %v252_v1, %v152_v16  ;;  %v57_v25 = vmul.f32 %v252_v1, %v153_v17 }
   0x6   :  { %v70_v18 = vadd.f32 %v257_v4, %v50_v10  ;;  %v71_v19 = vadd.f32 %v257_v4, %v51_v11  ;;  %v72_v22 = vadd.f32 %v257_v4, %v52_v14  ;;  %v73_v23 = vadd.f32 %v257_v4, %v53_v15 }
   0x7   :  { %v74_v29 = vadd.f32 %v257_v4, %v54_v20  ;;  %v75_v30 = vadd.f32 %v257_v4, %v55_v21  ;;  %v76_v33 = vadd.f32 %v257_v4, %v56_v24  ;;  %v77_v34 = vadd.f32 %v257_v4, %v57_v25 }
   0x8   :  { %v86_v27 = vmax.f32 %v70_v18, 0.0  ;;  %v87_v28 = vmax.f32 %v71_v19, 0.0  ;;  %v88_v31 = vmax.f32 %v72_v22, 0.0  ;;  %v89_v32 = vmax.f32 %v73_v23, 0.0 }
   0x9   :  { %v90_v37 = vmax.f32 %v74_v29, 0.0  ;;  %v91_v38 = vmax.f32 %v75_v30, 0.0  ;;  %v156_v39 = vunpack.c.l.bf16 %v213_v26  ;;  %v92_v42 = vmax.f32 %v76_v33, 0.0 }
   0xa   :  { %v173_v36 = vpack.c.bf16 %v87_v28, %v86_v27  ;;  %v178_v41 = vpack.c.bf16 %v89_v32, %v88_v31  ;;  %v93_v43 = vmax.f32 %v77_v34, 0.0  ;;  %v157_v44 = vunpack.c.h.bf16 %v213_v26 }
   0xb   :  { %v183_v46 = vpack.c.bf16 %v91_v38, %v90_v37  ;;  %v58_v47 = vmul.f32 %v252_v1, %v156_v39  ;;  %v160_v48 = vunpack.c.l.bf16 %v214_v35  ;;  %v161_v49 = vunpack.c.h.bf16 %v214_v35 }
   0xc   :  { %174 = vst [vmem:[%s339_s3] sm:$0xff] %v173_v36   ;;  %v188_v50 = vpack.c.bf16 %v93_v43, %v92_v42  ;;  %v59_v51 = vmul.f32 %v252_v1, %v157_v44  ;;  %v164_v52 = vunpack.c.l.bf16 %v215_v40  ;;  %v165_v53 = vunpack.c.h.bf16 %v215_v40 }
   0xd   :  { %217 = vst [vmem:[%s339_s3 + $0x8] sm:$0xff] %v178_v41   ;;  %v78_v54 = vadd.f32 %v257_v4, %v58_v47  ;;  %v60_v55 = vmul.f32 %v252_v1, %v160_v48  ;;  %v61_v56 = vmul.f32 %v252_v1, %v161_v49  ;;  %v168_v57 = vunpack.c.l.bf16 %v216_v45 }
   0xe   :  { %218 = vst [vmem:[%s339_s3 + $0x10] sm:$0xff] %v183_v46   ;;  %v79_v58 = vadd.f32 %v257_v4, %v59_v51  ;;  %v62_v59 = vmul.f32 %v252_v1, %v164_v52  ;;  %v63_v60 = vmul.f32 %v252_v1, %v165_v53  ;;  %v169_v61 = vunpack.c.h.bf16 %v216_v45 }
   0xf   :  { %219 = vst [vmem:[%s339_s3 + $0x18] sm:$0xff] %v188_v50   ;;  %v94_v62 = vmax.f32 %v78_v54, 0.0  ;;  %v80_v63 = vadd.f32 %v257_v4, %v60_v55  ;;  %v81_v0 = vadd.f32 %v257_v4, %v61_v56  ;;  %v64_v2 = vmul.f32 %v252_v1, %v168_v57 }
  0x10   :  { %v95_v3 = vmax.f32 %v79_v58, 0.0  ;;  %v82_v5 = vadd.f32 %v257_v4, %v62_v59  ;;  %v83_v6 = vadd.f32 %v257_v4, %v63_v60  ;;  %v65_v7 = vmul.f32 %v252_v1, %v169_v61 }
  0x11   :  { %v96_v8 = vmax.f32 %v80_v63, 0.0  ;;  %v97_v9 = vmax.f32 %v81_v0, 0.0  ;;  %v84_v10 = vadd.f32 %v257_v4, %v64_v2 }
  0x12   :  { %v193_v11 = vpack.c.bf16 %v95_v3, %v94_v62  ;;  %v98_v12 = vmax.f32 %v82_v5, 0.0  ;;  %v99_v13 = vmax.f32 %v83_v6, 0.0  ;;  %v85_v14 = vadd.f32 %v257_v4, %v65_v7 }
  0x13   :  { %v198_v15 = vpack.c.bf16 %v97_v9, %v96_v8  ;;  %v100_v16 = vmax.f32 %v84_v10, 0.0 }
  0x14   :  { %220 = vst [vmem:[%s339_s3 + $0x20] sm:$0xff] %v193_v11   ;;  %v203_v17 = vpack.c.bf16 %v99_v13, %v98_v12  ;;  %v101_v18 = vmax.f32 %v85_v14, 0.0 }
  0x15   :  { %221 = vst [vmem:[%s339_s3 + $0x28] sm:$0xff] %v198_v15  }
  0x16   :  { %222 = vst [vmem:[%s339_s3 + $0x30] sm:$0xff] %v203_v17   ;;  %v208_v1 = vpack.c.bf16 %v101_v18, %v100_v16 }
  0x18   :  { %223 = vst [vmem:[%s339_s3 + $0x38] sm:$0xff] %v208_v1  }

// kernel: res_bottleneck_block.8
= control target key start
LH: loop header
LB: loop body
LE: loop exit
PB: predicated region body
PF: predicated region fallthrough
CT: control target
= control target key end

     0   :  { %s1778_s15 = smov 0   ;;  %s2061_s0 = inlined_call_operand.vmem [shape: bf16[36,9,128], index: 0, kind: input, shape index: {}]   ;;  %s2062_s1 = inlined_call_operand.vmem [shape: bf16[36,9,128], index: 1, kind: input, shape index: {}]   ;;  %s2063_s2 = inlined_call_operand.vmem [shape: bf16[9,128,128], index: 2, kind: input, shape index: {}]   ;;  %s2064_s3 = inlined_call_operand.vmem [shape: bf16[16,8,128], index: 3, kind: output, shape index: {0}]   ;;  %s2065_s4 = inlined_call_operand.vmem [shape: f32[2,2,128], index: 4, kind: output, shape index: {1}]  }
   0x1 LB: > { %s1172_s16 = sadd.s32 4294967295, %s1746_s15   ;;  %p1176_p0 = scmp.ge.s32.totalorder %s1746_s15, 1  ;;  %s1746_s15 = sphi %s1778_s15, %s15_s15  }
   0x2   : > { %p179_p1 = scmp.lt.s32.totalorder %s1746_s15, 3 }
   0x4   : > { %p180_p2 = pnand %p1176_p0, %p179_p1 }
   0x5   : > { %s216_s17 = smul.u32 (!%p180_p2), 18, %s1172_s16  ;;  %s1181_s18 = sshll.u32 (!%p180_p2), %s1172_s16, 3 }
   0x6   : > { %183 = sbr.rel (%p180_p2) target bundleno = 260 (0x104), region = 32  ;;  %p231_p3 = scmp.lt.s32.totalorder (!%p180_p2), %s1181_s18, 15 }
   0x7   : > { %p217_p4 = scmp.lt.s32.totalorder (!%p180_p2), %s216_s17, 35  ;;  %p236_p5 = scmp.lt.s32.totalorder (!%p180_p2), %s1172_s16, 1 }
   0x8   : > { %s1807_s8 = smov (!%p180_p2), 0  }
   0xb   : > { %s2067_s18 = smov (!%p231_p3, %s1181_s18), 15  ;;  %s2069_s17 = smov (!%p217_p4, %s216_s17), 35  ;;  %v1752_v0 = vmov 0.0  }
   0xc   : > { %s1182_s19 = sshll.u32 %s2067_s18, 2  ;;  %s1635_s20 = sshll.u32 %s2069_s17, 3 }
   0xd   : > { %s1789_s23 = scalar_lea.vmem %s2064_s3, %s1182_s19  ;;  %s1794_s26 = scalar_lea.vmem %s2061_s0, %s1635_s20 }
   0xe   : > { %s1799_s29 = scalar_lea.vmem %s2062_s1, %s1635_s20  ;;  %s2071_s16 = smov (!%p236_p5, %s1172_s16), 1 }
   0xf   : > { %s1183_s30 = sshll.u32 %s2071_s16, 1 }
  0x10   : > { %s1804_s7 = scalar_lea.vmem %s2065_s4, %s1183_s30 }
  0x11   : > { %240 = vst [vmem:[%s1804_s7] sm:$0x3] %v1752_v0 }
  0x12 LB: >> { %v1655_v1 = vld [vmem:[%s2063_s2 + $0x78] sm:$0xff]  ;;  %v1654_v5 = vld [vmem:[%s2063_s2 + $0x70] sm:$0xff]  ;;  %v1653_v9 = vld [vmem:[%s2063_s2 + $0x68] sm:$0xff]  ;;  %s1638_s13 = sshll.u32 %s1750_s8, 4  ;;  %vm1042_vm0 = vcmask 1040384   ;;  %s1750_s8 = sphi %s1807_s8, %s246_s8  }
  0x13   : >> { %v1664_v2 = vld [vmem:[%s2063_s2 + $0xb8] sm:$0xff]  ;;  %336 = vmatpush.bf16.msra.mxu0 %v1655_v1  ;;  %v1663_v6 = vld [vmem:[%s2063_s2 + $0xb0] sm:$0xff]  ;;  %v1662_v10 = vld [vmem:[%s2063_s2 + $0xa8] sm:$0xff]  ;;  %s1864_s24 = scalar_lea.vmem %s1794_s26, %s1638_s13  ;;  %s1925_s25 = scalar_lea.vmem %s1799_s29, %s1638_s13 }
  0x14   : >> { %v1673_v3 = vld [vmem:[%s2063_s2 + $0xf8] sm:$0xff]  ;;  %490 = vmatpush.bf16.msra.mxu2 %v1664_v2  ;;  %v1672_v7 = vld [vmem:[%s2063_s2 + $0xf0] sm:$0xff]  ;;  %v1671_v11 = vld [vmem:[%s2063_s2 + $0xe8] sm:$0xff] }
  0x15   : >> { %v1646_v4 = vld [vmem:[%s2063_s2 + $0x38] sm:$0xff]  ;;  %574 = vmatpush.bf16.msra.mxu3 %v1673_v3  ;;  %v1645_v8 = vld [vmem:[%s2063_s2 + $0x30] sm:$0xff]  ;;  %v1644_v12 = vld [vmem:[%s2063_s2 + $0x28] sm:$0xff] }
  0x16   : >> { %397 = vmatpush.bf16.msra.mxu1 %v1646_v4  ;;  %v1652_v13 = vld [vmem:[%s2063_s2 + $0x60] sm:$0xff]  ;;  %v1651_v17 = vld [vmem:[%s2063_s2 + $0x58] sm:$0xff]  ;;  %v1650_v23 = vld [vmem:[%s2063_s2 + $0x50] sm:$0xff] }
  0x17   : >> { %337 = vmatpush.bf16.msra.mxu0 %v1654_v5  ;;  %v1661_v14 = vld [vmem:[%s2063_s2 + $0xa0] sm:$0xff]  ;;  %v1660_v18 = vld [vmem:[%s2063_s2 + $0x98] sm:$0xff]  ;;  %v1659_v24 = vld [vmem:[%s2063_s2 + $0x90] sm:$0xff] }
  0x18   : >> { %491 = vmatpush.bf16.msra.mxu2 %v1663_v6  ;;  %v1670_v15 = vld [vmem:[%s2063_s2 + $0xe0] sm:$0xff]  ;;  %v1669_v19 = vld [vmem:[%s2063_s2 + $0xd8] sm:$0xff]  ;;  %v1668_v26 = vld [vmem:[%s2063_s2 + $0xd0] sm:$0xff] }
  0x19   : >> { %575 = vmatpush.bf16.msra.mxu3 %v1672_v7  ;;  %v1643_v16 = vld [vmem:[%s2063_s2 + $0x20] sm:$0xff]  ;;  %v1642_v20 = vld [vmem:[%s2063_s2 + $0x18] sm:$0xff]  ;;  %v1641_v27 = vld [vmem:[%s2063_s2 + $0x10] sm:$0xff] }
  0x1a   : >> { %398 = vmatpush.bf16.msra.mxu1 %v1645_v8  ;;  %v1286_v21 = vld [vmem:[%s1864_s24] sm:$0xf]  ;;  %v1656_v22 = vld [vmem:[%s1864_s24] sm:$0x10]  ;;  %v1649_v28 = vld [vmem:[%s2063_s2 + $0x48] sm:$0xff] }
  0x1b   : >> { %338 = vmatpush.bf16.msra.mxu0 %v1653_v9  ;;  %v1287_v25 = vor.u32 %v1656_v22, %v1286_v21  ;;  %v1658_v29 = vld [vmem:[%s2063_s2 + $0x88] sm:$0xff]  ;;  %v1648_v33 = vld [vmem:[%s2063_s2 + $0x40] sm:$0xff]  ;;  %v1682_v37 = vld [vmem:[%s2063_s2 + $0x138] sm:$0xff] }
  0x1c   : >> { %492 = vmatpush.bf16.msra.mxu2 %v1662_v10  ;;  %v1667_v31 = vld [vmem:[%s2063_s2 + $0xc8] sm:$0xff]  ;;  %v1657_v34 = vld [vmem:[%s2063_s2 + $0x80] sm:$0xff]  ;;  %v1700_v38 = vld [vmem:[%s2063_s2 + $0x1b8] sm:$0xff] }
  0x1d   : >> { %576 = vmatpush.bf16.msra.mxu3 %v1671_v11  ;;  %v437_v30 = vshll.u32 %v1287_v25, 16  ;;  %v1640_v32 = vld [vmem:[%s2063_s2 + $0x8] sm:$0xff]  ;;  %v435_v35 = vshrl.u32 %v1287_v25, 16  ;;  %v1666_v39 = vld [vmem:[%s2063_s2 + $0xc0] sm:$0xff]  ;;  %v1709_v41 = vld [vmem:[%s2063_s2 + $0x1f8] sm:$0xff] }
  0x1e   : >> { %399 = vmatpush.bf16.msra.mxu1 %v1644_v12  ;;  %v1639_v40 = vld [vmem:[%s2063_s2] sm:$0xff]  ;;  %v1691_v42 = vld [vmem:[%s2063_s2 + $0x178] sm:$0xff]  ;;  %v1681_v44 = vld [vmem:[%s2063_s2 + $0x130] sm:$0xff] }
  0x1f   : >> { %339 = vmatpush.bf16.msra.mxu0 %v1652_v13  ;;  %v439_v36 = vrot.slane %v437_v30, 1  ;;  %v1699_v45 = vld [vmem:[%s2063_s2 + $0x1b0] sm:$0xff]  ;;  %v270_v46 = vld [vmem:[%s1925_s25] sm:$0xf]  ;;  %v1322_v49 = vld [vmem:[%s1864_s24 + $0x8] sm:$0xf] }
  0x20   : >> { %493 = vmatpush.bf16.msra.mxu2 %v1661_v14  ;;  %v1708_v47 = vld [vmem:[%s2063_s2 + $0x1f0] sm:$0xff]  ;;  %v251_v50 = vld [vmem:[%s1864_s24] sm:$0xf]  ;;  %v1680_v51 = vld [vmem:[%s2063_s2 + $0x128] sm:$0xff] }
  0x21   : >> { %577 = vmatpush.bf16.msra.mxu3 %v1670_v15  ;;  %v440_v43 = vor.u32 %v439_v36, %v435_v35  ;;  %v1690_v48 = vld [vmem:[%s2063_s2 + $0x170] sm:$0xff]  ;;  %v1698_v52 = vld [vmem:[%s2063_s2 + $0x1a8] sm:$0xff]  ;;  %v1679_v55 = vld [vmem:[%s2063_s2 + $0x120] sm:$0xff] }
  0x22   : >> { %400 = vmatpush.bf16.msra.mxu1 %v1643_v16  ;;  %v1707_v53 = vld [vmem:[%s2063_s2 + $0x1e8] sm:$0xff]  ;;  %v1697_v56 = vld [vmem:[%s2063_s2 + $0x1a0] sm:$0xff]  ;;  %v1678_v59 = vld [vmem:[%s2063_s2 + $0x118] sm:$0xff] }
  0x23   : >> { %340 = vmatpush.bf16.msra.mxu0 %v1651_v17  ;;  %v1689_v54 = vld [vmem:[%s2063_s2 + $0x168] sm:$0xff]  ;;  %v1706_v57 = vld [vmem:[%s2063_s2 + $0x1e0] sm:$0xff]  ;;  %v1696_v60 = vld [vmem:[%s2063_s2 + $0x198] sm:$0xff] }
  0x24   : >> { %494 = vmatpush.bf16.msra.mxu2 %v1660_v18  ;;  %v1688_v58 = vld [vmem:[%s2063_s2 + $0x160] sm:$0xff]  ;;  %v1705_v61 = vld [vmem:[%s2063_s2 + $0x1d8] sm:$0xff]  ;;  %v1442_v63 = vld [vmem:[%s1864_s24 + $0x8] sm:$0xf] }
  0x25   : >> { %578 = vmatpush.bf16.msra.mxu3 %v1669_v19  ;;  %v1687_v62 = vld [vmem:[%s2063_s2 + $0x158] sm:$0xff]  ;;  %v1683_v0 = vld [vmem:[%s1864_s24 + $0x8] sm:$0x10]  ;;  %v1677_v1 = vld [vmem:[%s2063_s2 + $0x110] sm:$0xff] }
  0x26   : >> { %401 = vmatpush.bf16.msra.mxu1 %v1642_v20  ;;  %v1695_v2 = vld [vmem:[%s2063_s2 + $0x190] sm:$0xff]  ;;  %v1443_v5 = vor.u32 %v1683_v0, %v1442_v63  ;;  %v1676_v6 = vld [vmem:[%s2063_s2 + $0x108] sm:$0xff]  ;;  %v1675_v11 = vld [vmem:[%s2063_s2 + $0x100] sm:$0xff] }
  0x27   : >> { %341 = vmatpush.bf16.msra.mxu0 %v1650_v23  ;;  %v1704_v3 = vld [vmem:[%s2063_s2 + $0x1d0] sm:$0xff]  ;;  %v1694_v7 = vld [vmem:[%s2063_s2 + $0x188] sm:$0xff]  ;;  %v1693_v12 = vld [vmem:[%s2063_s2 + $0x180] sm:$0xff] }
  0x28   : >> { %495 = vmatpush.bf16.msra.mxu2 %v1659_v24  ;;  %v1686_v4 = vld [vmem:[%s2063_s2 + $0x150] sm:$0xff]  ;;  %v1703_v8 = vld [vmem:[%s2063_s2 + $0x1c8] sm:$0xff]  ;;  %v697_v10 = vshll.u32 %v1443_v5, 16  ;;  %v1718_v13 = vld [vmem:[%s2063_s2 + $0x238] sm:$0xff]  ;;  %v695_v16 = vshrl.u32 %v1443_v5, 16 }
  0x29   : >> { %579 = vmatpush.bf16.msra.mxu3 %v1668_v26  ;;  %v1685_v9 = vld [vmem:[%s2063_s2 + $0x148] sm:$0xff]  ;;  %v1702_v14 = vld [vmem:[%s2063_s2 + $0x1c0] sm:$0xff]  ;;  %v1478_v18 = vld [vmem:[%s1864_s24 + $0x10] sm:$0xf] }
  0x2a   : >> { %402 = vmatpush.bf16.msra.mxu1 %v1641_v27  ;;  %v1684_v15 = vld [vmem:[%s2063_s2 + $0x140] sm:$0xff]  ;;  %v699_v17 = vrot.slane %v697_v10, 1  ;;  %v1373_v19 = vld [vmem:[%s1925_s25 + $0x8] sm:$0xf]  ;;  %v1717_v20 = vld [vmem:[%s2063_s2 + $0x230] sm:$0xff] }
  0x2b   : >> { %342 = vmatpush.bf16.msra.mxu0 %v1649_v28  ;;  %v1529_v21 = vld [vmem:[%s1925_s25 + $0x10] sm:$0xf]  ;;  %v1716_v23 = vld [vmem:[%s2063_s2 + $0x228] sm:$0xff]  ;;  %v1715_v24 = vld [vmem:[%s2063_s2 + $0x220] sm:$0xff] }
  0x2c   : >> { %496 = vmatpush.bf16.msra.mxu2 %v1658_v29  ;;  %v700_v22 = vor.u32 %v699_v17, %v695_v16  ;;  %v1714_v25 = vld [vmem:[%s2063_s2 + $0x218] sm:$0xff]  ;;  %v1598_v26 = vld [vmem:[%s1864_s24 + $0x10] sm:$0xf]  ;;  %v1710_v27 = vld [vmem:[%s1864_s24 + $0x10] sm:$0x10]  ;;  %s1632_s24 = sshll.u32 %s1750_s8, 2 }
  0x2d   : >> { %580 = vmatpush.bf16.msra.mxu3 %v1667_v31  ;;  %v1599_v28 = vor.u32 %v1710_v27, %v1598_v26  ;;  %v1713_v29 = vld [vmem:[%s2063_s2 + $0x210] sm:$0xff]  ;;  %v1712_v31 = vld [vmem:[%s2063_s2 + $0x208] sm:$0xff]  ;;  %s1026_s5 = scalar_lea.vmem %s1789_s23, %s1632_s24  ;;  %v1028_v10 = vld [vmem:[%s1804_s7] sm:$0x3]  ;;  %s246_s8 = sadd.s32 1, %s1750_s8  }
  0x2e   : >> { %403 = vmatpush.bf16.msra.mxu1 %v1640_v32  ;;  %p243_p6 = scmp.ge.s32.totalorder %s246_s8, 8  }
  0x2f   : >> { %343 = vmatpush.bf16.msra.mxu0 %v1648_v33  ;;  %v957_v30 = vshll.u32 %v1599_v28, 16  ;;  %v955_v32 = vshrl.u32 %v1599_v28, 16 }
  0x30   : >> { %497 = vmatpush.bf16.msra.mxu2 %v1657_v34  ;;  %v1711_v34 = vld [vmem:[%s2063_s2 + $0x200] sm:$0xff] }
  0x31   : >> { %581 = vmatpush.bf16.msra.mxu3 %v1666_v39  ;;  %v959_v33 = vrot.slane %v957_v30, 1 }
  0x32   : >> { %404 = vmatpush.bf16.msra.mxu1 %v1639_v40  ;;  %344 = vmatmul.bf16.vlgmr.msra.gmra.mxu0 %v270_v46 }
  0x33   : >> { %656 = vmatpush.bf16.msrb.mxu0 %v1682_v37  ;;  %498 = vmatmul.bf16.vlgmr.msra.gmra.mxu2 %v440_v43  ;;  %v960_v35 = vor.u32 %v959_v33, %v955_v32 }
  0x34   : >> { %834 = vmatpush.bf16.msrb.mxu2 %v1700_v38  ;;  %582 = vmatmul.bf16.vlgmr.msra.gmra.mxu3 %v1322_v49 }
  0x35   : >> { %916 = vmatpush.bf16.msrb.mxu3 %v1709_v41  ;;  %405 = vmatmul.bf16.vlgmr.msra.gmra.mxu1 %v251_v50 }
  0x36   : >> { %750 = vmatpush.bf16.msrb.mxu1 %v1691_v42 }
  0x37   : >> { %657 = vmatpush.bf16.msrb.mxu0 %v1681_v44 }
  0x38   : >> { %835 = vmatpush.bf16.msrb.mxu2 %v1699_v45 }
  0x39   : >> { %917 = vmatpush.bf16.msrb.mxu3 %v1708_v47 }
  0x3a   : >> { %751 = vmatpush.bf16.msrb.mxu1 %v1690_v48 }
  0x3b   : >> { %658 = vmatpush.bf16.msrb.mxu0 %v1680_v51 }
  0x3c   : >> { %836 = vmatpush.bf16.msrb.mxu2 %v1698_v52 }
  0x3d   : >> { %918 = vmatpush.bf16.msrb.mxu3 %v1707_v53 }
  0x3e   : >> { %752 = vmatpush.bf16.msrb.mxu1 %v1689_v54 }
  0x3f   : >> { %659 = vmatpush.bf16.msrb.mxu0 %v1679_v55 }
  0x40   : >> { %837 = vmatpush.bf16.msrb.mxu2 %v1697_v56 }
  0x41   : >> { %919 = vmatpush.bf16.msrb.mxu3 %v1706_v57 }
  0x42   : >> { %753 = vmatpush.bf16.msrb.mxu1 %v1688_v58 }
  0x43   : >> { %660 = vmatpush.bf16.msrb.mxu0 %v1678_v59 }
  0x44   : >> { %838 = vmatpush.bf16.msrb.mxu2 %v1696_v60 }
  0x45   : >> { %920 = vmatpush.bf16.msrb.mxu3 %v1705_v61 }
  0x46   : >> { %754 = vmatpush.bf16.msrb.mxu1 %v1687_v62 }
  0x47   : >> { %661 = vmatpush.bf16.msrb.mxu0 %v1677_v1 }
  0x48   : >> { %839 = vmatpush.bf16.msrb.mxu2 %v1695_v2 }
  0x49   : >> { %921 = vmatpush.bf16.msrb.mxu3 %v1704_v3 }
  0x4a   : >> { %755 = vmatpush.bf16.msrb.mxu1 %v1686_v4 }
  0x4b   : >> { %662 = vmatpush.bf16.msrb.mxu0 %v1676_v6 }
  0x4c   : >> { %840 = vmatpush.bf16.msrb.mxu2 %v1694_v7 }
  0x4d   : >> { %922 = vmatpush.bf16.msrb.mxu3 %v1703_v8 }
  0x4e   : >> { %756 = vmatpush.bf16.msrb.mxu1 %v1685_v9 }
  0x4f   : >> { %663 = vmatpush.bf16.msrb.mxu0 %v1675_v11 }
  0x50   : >> { %841 = vmatpush.bf16.msrb.mxu2 %v1693_v12 }
  0x51   : >> { %923 = vmatpush.bf16.msrb.mxu3 %v1702_v14 }
  0x52   : >> { %757 = vmatpush.bf16.msrb.mxu1 %v1684_v15  ;;  %664 = vmatmul.bf16.vlgmr.msrb.gmra.mxu0 %v1373_v19 }
  0x53   : >> { %1010 = vmatpush.bf16.msra.mxu0 %v1718_v13  ;;  %842 = vmatmul.bf16.vlgmr.msrb.gmra.mxu2 %v1478_v18 }
  0x54   : >> { %924 = vmatmul.bf16.vlgmr.msrb.gmra.mxu3 %v1529_v21 }
  0x55   : >> { %758 = vmatmul.bf16.vlgmr.msrb.gmra.mxu1 %v700_v22 }
  0x57   : >> { %1011 = vmatpush.bf16.msra.mxu0 %v1717_v20 }
  0x5b   : >> { %1012 = vmatpush.bf16.msra.mxu0 %v1716_v23 }
  0x5f   : >> { %1013 = vmatpush.bf16.msra.mxu0 %v1715_v24 }
  0x63   : >> { %1014 = vmatpush.bf16.msra.mxu0 %v1714_v25 }
  0x67   : >> { %1015 = vmatpush.bf16.msra.mxu0 %v1713_v29 }
  0x6b   : >> { %1016 = vmatpush.bf16.msra.mxu0 %v1712_v31 }
  0x6f   : >> { %1017 = vmatpush.bf16.msra.mxu0 %v1711_v34 }
  0x72   : >> { %1018 = vmatmul.bf16.vlgmr.msra.gmra.mxu0 %v960_v35 }
  0xaf   : >> { %v345_v36 = vpop.f32.mrf.mxu0 }
  0xb2   : >> { %v406_v37 = vpop.f32.mrf.mxu1 }
  0xb3   : >> { %v407_v46 = vadd.f32 %v406_v37, %v345_v36 }
  0xb6   : >> { %v499_v38 = vpop.f32.mrf.mxu2 }
  0xb7   : >> { %v583_v39 = vpop.f32.mrf.mxu3  ;;  %v347_v40 = vpop.f32.mrf.mxu0  ;;  %v503_v48 = vadd.f32 %v499_v38, %v407_v46 }
  0xb9   : >> { %v587_v52 = vadd.f32 %v583_v39, %v503_v48 }
  0xba   : >> { %v408_v41 = vpop.f32.mrf.mxu1 }
  0xbe   : >> { %v501_v42 = vpop.f32.mrf.mxu2 }
  0xbf   : >> { %v585_v43 = vpop.f32.mrf.mxu3 }
  0xcf   : >> { %v665_v44 = vpop.f32.mrf.mxu0 }
  0xd0   : >> { %v669_v54 = vadd.f32 %v665_v44, %v587_v52 }
  0xd2   : >> { %v759_v45 = vpop.f32.mrf.mxu1 }
  0xd3   : >> { %v763_v56 = vadd.f32 %v759_v45, %v669_v54 }
  0xd6   : >> { %v843_v47 = vpop.f32.mrf.mxu2 }
  0xd7   : >> { %v925_v49 = vpop.f32.mrf.mxu3  ;;  %v667_v50 = vpop.f32.mrf.mxu0  ;;  %v847_v57 = vadd.f32 %v843_v47, %v763_v56 }
  0xd9   : >> { %v929_v58 = vadd.f32 %v925_v49, %v847_v57 }
  0xda   : >> { %v761_v51 = vpop.f32.mrf.mxu1 }
  0xde   : >> { %v845_v53 = vpop.f32.mrf.mxu2 }
  0xdf   : >> { %v927_v55 = vpop.f32.mrf.mxu3 }
  0xef   : >> { %v1019_v59 = vpop.f32.mrf.mxu0 }
  0xf0   : >> { %v1023_v60 = vadd.f32 %v1019_v59, %v929_v58 }
  0xf2   : >> { %v1024_v61 = vpack.c.bf16 %v1023_v60, %v1023_v60  ;;  %v1029_v62 = vrot.slane %v1023_v60, 4  ;;  %v1035_v63 = vmul.f32 %v1023_v60, %v1023_v60 }
  0xf4   : >> { %1027 = vst [vmem:[%s1026_s5] sm:$0xf] %v1024_v61  ;;  %v1030_v0 = vadd.f32 %v1029_v62, %v1023_v60  ;;  %v1036_v1 = vrot.slane %v1035_v63, 4 }
  0xf6   : >> { %v1031_v2 = vrot.slane %v1030_v0, 2  ;;  %v1037_v3 = vadd.f32 %v1036_v1, %v1035_v63 }
  0xf7   : >> { %v1021_v4 = vpop.f32.mrf.mxu0 }
  0xf8   : >> { %v1032_v5 = vadd.f32 %v1031_v2, %v1030_v0  ;;  %v1038_v6 = vrot.slane %v1037_v3, 2 }
  0xfa   : >> { %v1033_v7 = vrot.slane %v1032_v5, 1  ;;  %v1039_v8 = vadd.f32 %v1038_v6, %v1037_v3 }
  0xfc   : >> { %v1040_v9 = vrot.slane %v1039_v8, 1  ;;  %v1034_v11 = vadd.f32 %v1033_v7, %v1032_v5 }
  0xfe   : >> { %v1041_v12 = vadd.f32 %v1040_v9, %v1039_v8 }
  0xff   : > { %245 = sbr.rel (!%p243_p6) target bundleno = 18 (0x12), region = 99 }
 0x100   : >> { %v1043_v13 = vsel %vm1042_vm0, %v1034_v11, %v1041_v12 }
 0x101   : >> { %v1044_v14 = vadd.f32 %v1043_v13, %v1028_v10 }
 0x103   : >> { %1045 = vst [vmem:[%s1804_s7] sm:$0x3] %v1044_v14 }
 0x104 PF: > { %s15_s15 = sadd.s32 1, %s1746_s15  }
 0x105   : > { %p12_p7 = scmp.ge.s32.totalorder %s15_s15, 4  }
 0x107   :  { %14 = sbr.rel (!%p12_p7) target bundleno = 1 (0x1), region = 110 }

// kernel: res_bottleneck_block.11
= control target key start
LH: loop header
LB: loop body
LE: loop exit
PB: predicated region body
PF: predicated region fallthrough
CT: control target
= control target key end

     0   :  { %s532_s0 = inlined_call_operand.vmem [shape: bf16[128,128], index: 0, kind: input, shape index: {}]   ;;  %s533_s1 = inlined_call_operand.vmem [shape: bf16[128,128], index: 1, kind: input, shape index: {}]   ;;  %s534_s2 = inlined_call_operand.vmem [shape: f32[1,128], index: 2, kind: input, shape index: {}]   ;;  %s535_s3 = inlined_call_operand.vmem [shape: f32[1,128], index: 3, kind: input, shape index: {}]   ;;  %s536_s4 = inlined_call_operand.vmem [shape: f32[1,128], index: 4, kind: input, shape index: {}]   ;;  %s537_s5 = inlined_call_operand.vmem [shape: f32[1,128], index: 5, kind: input, shape index: {}]   ;;  %s538_s6 = inlined_call_operand.vmem [shape: f32[128,128], index: 6, kind: output, shape index: {}]  }
   0x1   :  { %v236_v0 = vld [vmem:[%s532_s0] sm:$0xff]   ;;  %v299_v12 = vld [vmem:[%s532_s0 + $0x8] sm:$0xff]   ;;  %v300_v22 = vld [vmem:[%s532_s0 + $0x10] sm:$0xff]  }
   0x2   :  { %v358_v1 = vld [vmem:[%s534_s2] ss:$0 sm:$0xff]  ;;  %v237_v2 = vunpack.c.l.bf16 %v236_v0  ;;  %v238_v5 = vunpack.c.h.bf16 %v236_v0  ;;  %v306_v13 = vld [vmem:[%s533_s1 + $0x8] sm:$0xff]   ;;  %v241_v16 = vunpack.c.l.bf16 %v299_v12  ;;  %v242_v20 = vunpack.c.h.bf16 %v299_v12  ;;  %v307_v23 = vld [vmem:[%s533_s1 + $0x10] sm:$0xff]  }
   0x3   :  { %v363_v3 = vld [vmem:[%s535_s3] ss:$0 sm:$0xff]  ;;  %v273_v17 = vunpack.c.l.bf16 %v306_v13  ;;  %v274_v21 = vunpack.c.h.bf16 %v306_v13  ;;  %v245_v34 = vunpack.c.l.bf16 %v300_v22  ;;  %v277_v35 = vunpack.c.l.bf16 %v307_v23  ;;  %v301_v44 = vld [vmem:[%s532_s0 + $0x18] sm:$0xff]  }
   0x4   :  { %v268_v4 = vld [vmem:[%s533_s1] sm:$0xff]   ;;  %v59_v9 = vmul.f32 %v358_v1, %v237_v2  ;;  %v60_v11 = vmul.f32 %v358_v1, %v238_v5  ;;  %v61_v26 = vmul.f32 %v358_v1, %v241_v16  ;;  %v62_v30 = vmul.f32 %v358_v1, %v242_v20  ;;  %v308_v45 = vld [vmem:[%s533_s1 + $0x18] sm:$0xff]  }
   0x5   :  { %v269_v6 = vunpack.c.l.bf16 %v268_v4  ;;  %v371_v7 = vld [vmem:[%s536_s4] ss:$0 sm:$0xff]  ;;  %v270_v8 = vunpack.c.h.bf16 %v268_v4  ;;  %v63_v41 = vmul.f32 %v358_v1, %v245_v34  ;;  %v246_v43 = vunpack.c.h.bf16 %v300_v22 }
   0x6   :  { %v377_v10 = vld [vmem:[%s537_s5] ss:$0 sm:$0xff]  ;;  %v79_v18 = vadd.f32 %v363_v3, %v59_v9  ;;  %v80_v19 = vadd.f32 %v363_v3, %v60_v11  ;;  %v149_v27 = vmul.f32 %v371_v7, %v273_v17  ;;  %v150_v31 = vmul.f32 %v371_v7, %v274_v21 }
   0x7   :  { %v147_v14 = vmul.f32 %v371_v7, %v269_v6  ;;  %v148_v15 = vmul.f32 %v371_v7, %v270_v8  ;;  %v81_v32 = vadd.f32 %v363_v3, %v61_v26  ;;  %v82_v38 = vadd.f32 %v363_v3, %v62_v30  ;;  %v302_v62 = vld [vmem:[%s532_s0 + $0x20] sm:$0xff]  }
   0x8   :  { %v95_v28 = vmax.f32 %v79_v18, 0.0  ;;  %v96_v29 = vmax.f32 %v80_v19, 0.0  ;;  %v169_v33 = vadd.f32 %v377_v10, %v149_v27  ;;  %v170_v39 = vadd.f32 %v377_v10, %v150_v31  ;;  %v309_v63 = vld [vmem:[%s533_s1 + $0x20] sm:$0xff]  }
   0x9   :  { %v167_v24 = vadd.f32 %v377_v10, %v147_v14  ;;  %v168_v25 = vadd.f32 %v377_v10, %v148_v15  ;;  %v97_v40 = vmax.f32 %v81_v32, 0.0  ;;  %v151_v42 = vmul.f32 %v371_v7, %v277_v35 }
   0xa   :  { %v98_v48 = vmax.f32 %v82_v38, 0.0  ;;  %v278_v49 = vunpack.c.h.bf16 %v307_v23  ;;  %v83_v51 = vadd.f32 %v363_v3, %v63_v41  ;;  %v64_v53 = vmul.f32 %v358_v1, %v246_v43  ;;  %v311_v43 = vld [vmem:[%s533_s1 + $0x30] sm:$0xff]  }
   0xb   :  { %v183_v36 = vadd.f32 %v167_v24, %v95_v28  ;;  %v184_v37 = vadd.f32 %v168_v25, %v96_v29  ;;  %v185_v50 = vadd.f32 %v169_v33, %v97_v40  ;;  %v171_v52 = vadd.f32 %v377_v10, %v151_v42  ;;  %v303_v24 = vld [vmem:[%s532_s0 + $0x28] sm:$0xff]   ;;  %v304_v42 = vld [vmem:[%s532_s0 + $0x30] sm:$0xff]  }
   0xc   :  { %v186_v54 = vadd.f32 %v170_v39, %v98_v48  ;;  %v152_v55 = vmul.f32 %v371_v7, %v278_v49  ;;  %v249_v56 = vunpack.c.l.bf16 %v301_v44  ;;  %v281_v57 = vunpack.c.l.bf16 %v308_v45  ;;  %v310_v25 = vld [vmem:[%s533_s1 + $0x28] sm:$0xff]  }
   0xd   :  { %v199_v46 = vmax.f32 %v183_v36, 0.0  ;;  %v200_v47 = vmax.f32 %v184_v37, 0.0  ;;  %v201_v58 = vmax.f32 %v185_v50, 0.0  ;;  %v99_v59 = vmax.f32 %v83_v51, 0.0 }
   0xe   :  { %v84_v60 = vadd.f32 %v363_v3, %v64_v53  ;;  %v250_v61 = vunpack.c.h.bf16 %v301_v44  ;;  %v202_v0 = vmax.f32 %v186_v54, 0.0  ;;  %v172_v2 = vadd.f32 %v377_v10, %v152_v55 }
   0xf   :  { %215 = vst [vmem:[%s538_s6] sm:$0xff] %v199_v46  ;;  %v65_v4 = vmul.f32 %v358_v1, %v249_v56  ;;  %v153_v5 = vmul.f32 %v371_v7, %v281_v57  ;;  %v187_v6 = vadd.f32 %v171_v52, %v99_v59  ;;  %v282_v11 = vunpack.c.h.bf16 %v308_v45 }
  0x10   :  { %216 = vst [vmem:[%s538_s6 + $0x8] sm:$0xff] %v200_v47  ;;  %v100_v8 = vmax.f32 %v84_v60, 0.0  ;;  %v66_v9 = vmul.f32 %v358_v1, %v250_v61  ;;  %v253_v14 = vunpack.c.l.bf16 %v302_v62  ;;  %v285_v15 = vunpack.c.l.bf16 %v309_v63 }
  0x11   :  { %217 = vst [vmem:[%s538_s6 + $0x10] sm:$0xff] %v201_v58  ;;  %v85_v12 = vadd.f32 %v363_v3, %v65_v4  ;;  %v173_v13 = vadd.f32 %v377_v10, %v153_v5  ;;  %v203_v16 = vmax.f32 %v187_v6, 0.0  ;;  %v154_v19 = vmul.f32 %v371_v7, %v282_v11 }
  0x12   :  { %218 = vst [vmem:[%s538_s6 + $0x18] sm:$0xff] %v202_v0  ;;  %v188_v17 = vadd.f32 %v172_v2, %v100_v8  ;;  %v86_v18 = vadd.f32 %v363_v3, %v66_v9  ;;  %v67_v21 = vmul.f32 %v358_v1, %v253_v14  ;;  %v155_v22 = vmul.f32 %v371_v7, %v285_v15  ;;  %v305_v0 = vld [vmem:[%s532_s0 + $0x38] sm:$0xff]  }
  0x13   :  { %v101_v20 = vmax.f32 %v85_v12, 0.0  ;;  %v254_v23 = vunpack.c.h.bf16 %v302_v62  ;;  %219 = vst [vmem:[%s538_s6 + $0x20] sm:$0xff] %v203_v16  ;;  %v174_v28 = vadd.f32 %v377_v10, %v154_v19  ;;  %v286_v29 = vunpack.c.h.bf16 %v309_v63  ;;  %v312_v2 = vld [vmem:[%s533_s1 + $0x38] sm:$0xff]  }
  0x14   :  { %v204_v26 = vmax.f32 %v188_v17, 0.0  ;;  %v102_v27 = vmax.f32 %v86_v18, 0.0  ;;  %v87_v31 = vadd.f32 %v363_v3, %v67_v21  ;;  %v175_v32 = vadd.f32 %v377_v10, %v155_v22 }
  0x15   :  { %v189_v30 = vadd.f32 %v173_v13, %v101_v20  ;;  %v68_v33 = vmul.f32 %v358_v1, %v254_v23  ;;  %v156_v35 = vmul.f32 %v371_v7, %v286_v29  ;;  %v257_v36 = vunpack.c.l.bf16 %v303_v24 }
  0x16   :  { %220 = vst [vmem:[%s538_s6 + $0x28] sm:$0xff] %v204_v26  ;;  %v190_v34 = vadd.f32 %v174_v28, %v102_v27  ;;  %v289_v37 = vunpack.c.l.bf16 %v310_v25  ;;  %v103_v39 = vmax.f32 %v87_v31, 0.0  ;;  %v258_v41 = vunpack.c.h.bf16 %v303_v24 }
  0x17   :  { %v205_v38 = vmax.f32 %v189_v30, 0.0  ;;  %v88_v40 = vadd.f32 %v363_v3, %v68_v33  ;;  %v176_v45 = vadd.f32 %v377_v10, %v156_v35  ;;  %v69_v46 = vmul.f32 %v358_v1, %v257_v36 }
  0x18   :  { %v206_v44 = vmax.f32 %v190_v34, 0.0  ;;  %v157_v47 = vmul.f32 %v371_v7, %v289_v37  ;;  %v191_v48 = vadd.f32 %v175_v32, %v103_v39  ;;  %v70_v50 = vmul.f32 %v358_v1, %v258_v41 }
  0x19   :  { %221 = vst [vmem:[%s538_s6 + $0x30] sm:$0xff] %v205_v38  ;;  %v104_v49 = vmax.f32 %v88_v40, 0.0  ;;  %v290_v51 = vunpack.c.h.bf16 %v310_v25  ;;  %v89_v52 = vadd.f32 %v363_v3, %v69_v46  ;;  %v261_v54 = vunpack.c.l.bf16 %v304_v42 }
  0x1a   :  { %222 = vst [vmem:[%s538_s6 + $0x38] sm:$0xff] %v206_v44  ;;  %v177_v53 = vadd.f32 %v377_v10, %v157_v47  ;;  %v293_v55 = vunpack.c.l.bf16 %v311_v43  ;;  %v207_v56 = vmax.f32 %v191_v48, 0.0  ;;  %v90_v58 = vadd.f32 %v363_v3, %v70_v50 }
  0x1b   :  { %v192_v57 = vadd.f32 %v176_v45, %v104_v49  ;;  %v158_v59 = vmul.f32 %v371_v7, %v290_v51  ;;  %v105_v60 = vmax.f32 %v89_v52, 0.0  ;;  %v71_v61 = vmul.f32 %v358_v1, %v261_v54 }
  0x1c   :  { %v159_v62 = vmul.f32 %v371_v7, %v293_v55  ;;  %v262_v63 = vunpack.c.h.bf16 %v304_v42  ;;  %223 = vst [vmem:[%s538_s6 + $0x40] sm:$0xff] %v207_v56  ;;  %v106_v5 = vmax.f32 %v90_v58, 0.0  ;;  %v294_v8 = vunpack.c.h.bf16 %v311_v43 }
  0x1d   :  { %v208_v4 = vmax.f32 %v192_v57, 0.0  ;;  %v178_v6 = vadd.f32 %v377_v10, %v158_v59  ;;  %v193_v9 = vadd.f32 %v177_v53, %v105_v60  ;;  %v91_v11 = vadd.f32 %v363_v3, %v71_v61 }
  0x1e   :  { %v179_v12 = vadd.f32 %v377_v10, %v159_v62  ;;  %v72_v13 = vmul.f32 %v358_v1, %v262_v63  ;;  %v160_v15 = vmul.f32 %v371_v7, %v294_v8  ;;  %v265_v16 = vunpack.c.l.bf16 %v305_v0 }
  0x1f   :  { %224 = vst [vmem:[%s538_s6 + $0x48] sm:$0xff] %v208_v4  ;;  %v194_v14 = vadd.f32 %v178_v6, %v106_v5  ;;  %v297_v17 = vunpack.c.l.bf16 %v312_v2  ;;  %v209_v18 = vmax.f32 %v193_v9, 0.0  ;;  %v107_v19 = vmax.f32 %v91_v11, 0.0 }
  0x20   :  { %v92_v20 = vadd.f32 %v363_v3, %v72_v13  ;;  %v266_v21 = vunpack.c.h.bf16 %v305_v0  ;;  %v180_v23 = vadd.f32 %v377_v10, %v160_v15  ;;  %v73_v24 = vmul.f32 %v358_v1, %v265_v16 }
  0x21   :  { %v210_v22 = vmax.f32 %v194_v14, 0.0  ;;  %v161_v25 = vmul.f32 %v371_v7, %v297_v17  ;;  %225 = vst [vmem:[%s538_s6 + $0x50] sm:$0xff] %v209_v18  ;;  %v195_v26 = vadd.f32 %v179_v12, %v107_v19  ;;  %v298_v29 = vunpack.c.h.bf16 %v312_v2 }
  0x22   :  { %v108_v27 = vmax.f32 %v92_v20, 0.0  ;;  %v74_v28 = vmul.f32 %v358_v1, %v266_v21  ;;  %v93_v30 = vadd.f32 %v363_v3, %v73_v24 }
  0x23   :  { %226 = vst [vmem:[%s538_s6 + $0x58] sm:$0xff] %v210_v22  ;;  %v181_v31 = vadd.f32 %v377_v10, %v161_v25  ;;  %v211_v32 = vmax.f32 %v195_v26, 0.0  ;;  %v162_v35 = vmul.f32 %v371_v7, %v298_v29 }
  0x24   :  { %v196_v33 = vadd.f32 %v180_v23, %v108_v27  ;;  %v94_v34 = vadd.f32 %v363_v3, %v74_v28  ;;  %v109_v36 = vmax.f32 %v93_v30, 0.0 }
  0x25   :  { %227 = vst [vmem:[%s538_s6 + $0x60] sm:$0xff] %v211_v32  ;;  %v182_v38 = vadd.f32 %v377_v10, %v162_v35 }
  0x26   :  { %v212_v1 = vmax.f32 %v196_v33, 0.0  ;;  %v110_v37 = vmax.f32 %v94_v34, 0.0  ;;  %v197_v39 = vadd.f32 %v181_v31, %v109_v36 }
  0x28   :  { %228 = vst [vmem:[%s538_s6 + $0x68] sm:$0xff] %v212_v1  ;;  %v198_v40 = vadd.f32 %v182_v38, %v110_v37  ;;  %v213_v41 = vmax.f32 %v197_v39, 0.0 }
  0x2a   :  { %v214_v42 = vmax.f32 %v198_v40, 0.0  ;;  %229 = vst [vmem:[%s538_s6 + $0x70] sm:$0xff] %v213_v41 }
  0x2c   :  { %230 = vst [vmem:[%s538_s6 + $0x78] sm:$0xff] %v214_v42 }

// kernel: res_bottleneck_block.10
= control target key start
LH: loop header
LB: loop body
LE: loop exit
PB: predicated region body
PF: predicated region fallthrough
CT: control target
= control target key end

     0   :  { %vm497_vm0 = vcmask 1040384   ;;  %s1108_s2 = inlined_call_operand.vmem [shape: bf16[128,128], index: 2, kind: input, shape index: {}]   ;;  %s1109_s3 = inlined_call_operand.vmem [shape: bf16[128,128], index: 3, kind: input, shape index: {}]   ;;  %s1110_s0 = inlined_call_operand.vmem [shape: bf16[128,128], index: 0, kind: input, shape index: {}]   ;;  %s1111_s1 = inlined_call_operand.vmem [shape: bf16[128,128], index: 1, kind: input, shape index: {}]   ;;  %s1112_s4 = inlined_call_operand.vmem [shape: bf16[128,128], index: 4, kind: output, shape index: {0}]   ;;  %s1113_s5 = inlined_call_operand.vmem [shape: bf16[128,128], index: 5, kind: output, shape index: {1}]   ;;  %s1114_s6 = inlined_call_operand.vmem [shape: f32[1,2,128], index: 6, kind: output, shape index: {2}]   ;;  %s1115_s7 = inlined_call_operand.vmem [shape: f32[1,2,128], index: 7, kind: output, shape index: {3}]  }
   0x1   :  { %v719_v0 = vld [vmem:[%s1108_s2 + $0x38] sm:$0xff]  ;;  %v718_v2 = vld [vmem:[%s1108_s2 + $0x30] sm:$0xff]  ;;  %v717_v4 = vld [vmem:[%s1108_s2 + $0x28] sm:$0xff] }
   0x2   :  { %v735_v1 = vld [vmem:[%s1109_s3 + $0x38] sm:$0xff]  ;;  %149 = vmatpush.bf16.msra.mxu0 %v719_v0  ;;  %v734_v3 = vld [vmem:[%s1109_s3 + $0x30] sm:$0xff]  ;;  %830 = vmatpush.bf16.msra.mxu2 %v719_v0  ;;  %v733_v5 = vld [vmem:[%s1109_s3 + $0x28] sm:$0xff] }
   0x3   :  { %326 = vmatpush.bf16.msra.mxu1 %v735_v1  ;;  %838 = vmatpush.bf16.msra.mxu3 %v735_v1  ;;  %v716_v6 = vld [vmem:[%s1108_s2 + $0x20] sm:$0xff]  ;;  %v715_v8 = vld [vmem:[%s1108_s2 + $0x18] sm:$0xff]  ;;  %v714_v10 = vld [vmem:[%s1108_s2 + $0x10] sm:$0xff] }
   0x4   :  { %v732_v7 = vld [vmem:[%s1109_s3 + $0x20] sm:$0xff]  ;;  %v731_v9 = vld [vmem:[%s1109_s3 + $0x18] sm:$0xff]  ;;  %v730_v11 = vld [vmem:[%s1109_s3 + $0x10] sm:$0xff] }
   0x5   :  { %v713_v12 = vld [vmem:[%s1108_s2 + $0x8] sm:$0xff]  ;;  %v712_v14 = vld [vmem:[%s1108_s2] sm:$0xff]  ;;  %v706_v24 = vld [vmem:[%s1110_s0 + $0x10] sm:$0xff] }
   0x6   :  { %150 = vmatpush.bf16.msra.mxu0 %v718_v2  ;;  %831 = vmatpush.bf16.msra.mxu2 %v718_v2  ;;  %v729_v13 = vld [vmem:[%s1109_s3 + $0x8] sm:$0xff]  ;;  %v728_v15 = vld [vmem:[%s1109_s3] sm:$0xff]  ;;  %v722_v25 = vld [vmem:[%s1111_s1 + $0x10] sm:$0xff] }
   0x7   :  { %327 = vmatpush.bf16.msra.mxu1 %v734_v3  ;;  %839 = vmatpush.bf16.msra.mxu3 %v734_v3  ;;  %v704_v16 = vld [vmem:[%s1110_s0] sm:$0xff]  ;;  %v705_v20 = vld [vmem:[%s1110_s0 + $0x8] sm:$0xff]  ;;  %v710_v26 = vld [vmem:[%s1110_s0 + $0x30] sm:$0xff] }
   0x8   :  { %v720_v17 = vld [vmem:[%s1111_s1] sm:$0xff]  ;;  %v721_v21 = vld [vmem:[%s1111_s1 + $0x8] sm:$0xff]  ;;  %v726_v27 = vld [vmem:[%s1111_s1 + $0x30] sm:$0xff] }
   0x9   :  { %v708_v18 = vld [vmem:[%s1110_s0 + $0x20] sm:$0xff]  ;;  %v709_v22 = vld [vmem:[%s1110_s0 + $0x28] sm:$0xff]  ;;  %v707_v28 = vld [vmem:[%s1110_s0 + $0x18] sm:$0xff] }
   0xa   :  { %151 = vmatpush.bf16.msra.mxu0 %v717_v4  ;;  %832 = vmatpush.bf16.msra.mxu2 %v717_v4  ;;  %v724_v19 = vld [vmem:[%s1111_s1 + $0x20] sm:$0xff]  ;;  %v725_v23 = vld [vmem:[%s1111_s1 + $0x28] sm:$0xff]  ;;  %v723_v29 = vld [vmem:[%s1111_s1 + $0x18] sm:$0xff] }
   0xb   :  { %328 = vmatpush.bf16.msra.mxu1 %v733_v5  ;;  %840 = vmatpush.bf16.msra.mxu3 %v733_v5  ;;  %v711_v30 = vld [vmem:[%s1110_s0 + $0x38] sm:$0xff] }
   0xc   :  { %v727_v31 = vld [vmem:[%s1111_s1 + $0x38] sm:$0xff] }
   0xe   :  { %152 = vmatpush.bf16.msra.mxu0 %v716_v6  ;;  %833 = vmatpush.bf16.msra.mxu2 %v716_v6 }
   0xf   :  { %329 = vmatpush.bf16.msra.mxu1 %v732_v7  ;;  %841 = vmatpush.bf16.msra.mxu3 %v732_v7 }
  0x12   :  { %153 = vmatpush.bf16.msra.mxu0 %v715_v8  ;;  %834 = vmatpush.bf16.msra.mxu2 %v715_v8 }
  0x13   :  { %330 = vmatpush.bf16.msra.mxu1 %v731_v9  ;;  %842 = vmatpush.bf16.msra.mxu3 %v731_v9 }
  0x16   :  { %154 = vmatpush.bf16.msra.mxu0 %v714_v10  ;;  %835 = vmatpush.bf16.msra.mxu2 %v714_v10 }
  0x17   :  { %331 = vmatpush.bf16.msra.mxu1 %v730_v11  ;;  %843 = vmatpush.bf16.msra.mxu3 %v730_v11 }
  0x1a   :  { %155 = vmatpush.bf16.msra.mxu0 %v713_v12  ;;  %836 = vmatpush.bf16.msra.mxu2 %v713_v12 }
  0x1b   :  { %332 = vmatpush.bf16.msra.mxu1 %v729_v13  ;;  %844 = vmatpush.bf16.msra.mxu3 %v729_v13 }
  0x1e   :  { %156 = vmatpush.bf16.msra.mxu0 %v712_v14  ;;  %837 = vmatpush.bf16.msra.mxu2 %v712_v14 }
  0x1f   :  { %333 = vmatpush.bf16.msra.mxu1 %v728_v15  ;;  %845 = vmatpush.bf16.msra.mxu3 %v728_v15 }
  0x21   :  { %157 = vmatmul.bf16.vlgmr.msra.gmra.mxu0 %v704_v16  ;;  %177 = vmatmul.bf16.vlgmr.msra.gmra.mxu2 %v708_v18 }
  0x22   :  { %334 = vmatmul.bf16.vlgmr.msra.gmra.mxu1 %v720_v17  ;;  %354 = vmatmul.bf16.vlgmr.msra.gmra.mxu3 %v724_v19 }
  0x31   :  { %162 = vmatmul.bf16.gmra.mxu0 %v705_v20  ;;  %182 = vmatmul.bf16.gmra.mxu2 %v709_v22 }
  0x32   :  { %339 = vmatmul.bf16.gmra.mxu1 %v721_v21  ;;  %359 = vmatmul.bf16.gmra.mxu3 %v725_v23 }
  0x41   :  { %167 = vmatmul.bf16.gmra.mxu0 %v706_v24  ;;  %187 = vmatmul.bf16.gmra.mxu2 %v710_v26 }
  0x42   :  { %344 = vmatmul.bf16.gmra.mxu1 %v722_v25  ;;  %364 = vmatmul.bf16.gmra.mxu3 %v726_v27 }
  0x51   :  { %172 = vmatmul.bf16.gmra.mxu0 %v707_v28  ;;  %192 = vmatmul.bf16.gmra.mxu2 %v711_v30 }
  0x52   :  { %349 = vmatmul.bf16.gmra.mxu1 %v723_v29  ;;  %369 = vmatmul.bf16.gmra.mxu3 %v727_v31 }
  0x9e   :  { %v158_v32 = vpop.f32.mrf.mxu0 }
  0x9f   :  { %v335_v33 = vpop.f32.mrf.mxu1  ;;  %v460_v2 = vmul.f32 %v158_v32, %v158_v32 }
  0xa0   :  { %v521_v4 = vmul.f32 %v335_v33, %v335_v33 }
  0xa4   :  { %v982_v34 = vpop.f32.mrf.mxu2 }
  0xa5   :  { %v984_v35 = vpop.f32.mrf.mxu3 }
  0xa6   :  { %v160_v36 = vpop.f32.mrf.mxu0 }
  0xa7   :  { %v337_v37 = vpop.f32.mrf.mxu1  ;;  %v739_v38 = vpack.c.bf16 %v160_v36, %v158_v32  ;;  %v461_v0 = vmul.f32 %v160_v36, %v160_v36  ;;  %v439_v5 = vadd.f32 %v160_v36, %v158_v32 }
  0xa8   :  { %v779_v39 = vpack.c.bf16 %v337_v37, %v335_v33  ;;  %v522_v1 = vmul.f32 %v337_v37, %v337_v37  ;;  %v500_v6 = vadd.f32 %v337_v37, %v335_v33 }
  0xa9   :  { %740 = vst [vmem:[%s1112_s4] sm:$0xff] %v739_v38   ;;  %v476_v8 = vadd.f32 %v461_v0, %v460_v2 }
  0xaa   :  { %780 = vst [vmem:[%s1113_s5] sm:$0xff] %v779_v39   ;;  %v537_v10 = vadd.f32 %v522_v1, %v521_v4 }
  0xac   :  { %v992_v40 = vpop.f32.mrf.mxu2 }
  0xad   :  { %v994_v41 = vpop.f32.mrf.mxu3  ;;  %v759_v43 = vpack.c.bf16 %v992_v40, %v982_v34 }
  0xae   :  { %v163_v42 = vpop.f32.mrf.mxu0  ;;  %v799_v45 = vpack.c.bf16 %v994_v41, %v984_v35 }
  0xaf   :  { %v340_v44 = vpop.f32.mrf.mxu1  ;;  %819 = vst [vmem:[%s1112_s4 + $0x20] sm:$0xff] %v759_v43   ;;  %v462_v3 = vmul.f32 %v163_v42, %v163_v42  ;;  %v440_v11 = vadd.f32 %v439_v5, %v163_v42 }
  0xb0   :  { %826 = vst [vmem:[%s1113_s5 + $0x20] sm:$0xff] %v799_v45   ;;  %v523_v7 = vmul.f32 %v340_v44, %v340_v44  ;;  %v501_v12 = vadd.f32 %v500_v6, %v340_v44  ;;  %v469_v6 = vmul.f32 %v992_v40, %v992_v40 }
  0xb1   :  { %v477_v16 = vadd.f32 %v476_v8, %v462_v3  ;;  %v529_v3 = vmul.f32 %v984_v35, %v984_v35 }
  0xb2   :  { %v538_v22 = vadd.f32 %v537_v10, %v523_v7 }
  0xb4   :  { %v1006_v46 = vpop.f32.mrf.mxu2 }
  0xb5   :  { %v1008_v47 = vpop.f32.mrf.mxu3 }
  0xb6   :  { %v165_v48 = vpop.f32.mrf.mxu0 }
  0xb7   :  { %v342_v49 = vpop.f32.mrf.mxu1  ;;  %v744_v50 = vpack.c.bf16 %v165_v48, %v163_v42  ;;  %v463_v9 = vmul.f32 %v165_v48, %v165_v48  ;;  %v441_v23 = vadd.f32 %v440_v11, %v165_v48  ;;  %v470_v11 = vmul.f32 %v1006_v46, %v1006_v46 }
  0xb8   :  { %v784_v51 = vpack.c.bf16 %v342_v49, %v340_v44  ;;  %v524_v13 = vmul.f32 %v342_v49, %v342_v49  ;;  %v502_v25 = vadd.f32 %v501_v12, %v342_v49 }
  0xb9   :  { %816 = vst [vmem:[%s1112_s4 + $0x8] sm:$0xff] %v744_v50   ;;  %v478_v24 = vadd.f32 %v477_v16, %v463_v9 }
  0xba   :  { %823 = vst [vmem:[%s1113_s5 + $0x8] sm:$0xff] %v784_v51   ;;  %v539_v28 = vadd.f32 %v538_v22, %v524_v13 }
  0xbc   :  { %v1016_v52 = vpop.f32.mrf.mxu2 }
  0xbd   :  { %v1018_v53 = vpop.f32.mrf.mxu3  ;;  %v764_v55 = vpack.c.bf16 %v1016_v52, %v1006_v46 }
  0xbe   :  { %v168_v54 = vpop.f32.mrf.mxu0  ;;  %v804_v57 = vpack.c.bf16 %v1018_v53, %v1008_v47 }
  0xbf   :  { %v345_v56 = vpop.f32.mrf.mxu1  ;;  %820 = vst [vmem:[%s1112_s4 + $0x28] sm:$0xff] %v764_v55   ;;  %v464_v17 = vmul.f32 %v168_v54, %v168_v54  ;;  %v442_v29 = vadd.f32 %v441_v23, %v168_v54 }
  0xc0   :  { %827 = vst [vmem:[%s1113_s5 + $0x28] sm:$0xff] %v804_v57   ;;  %v525_v26 = vmul.f32 %v345_v56, %v345_v56  ;;  %v503_v31 = vadd.f32 %v502_v25, %v345_v56 }
  0xc1   :  { %v479_v30 = vadd.f32 %v478_v24, %v464_v17  ;;  %v531_v17 = vmul.f32 %v1008_v47, %v1008_v47 }
  0xc2   :  { %v540_v37 = vadd.f32 %v539_v28, %v525_v26 }
  0xc4   :  { %v1030_v58 = vpop.f32.mrf.mxu2 }
  0xc5   :  { %v1032_v59 = vpop.f32.mrf.mxu3 }
  0xc6   :  { %v170_v60 = vpop.f32.mrf.mxu0 }
  0xc7   :  { %v347_v61 = vpop.f32.mrf.mxu1  ;;  %v749_v62 = vpack.c.bf16 %v170_v60, %v168_v54  ;;  %v465_v27 = vmul.f32 %v170_v60, %v170_v60  ;;  %v443_v36 = vadd.f32 %v442_v29, %v170_v60  ;;  %v468_v60 = vmul.f32 %v982_v34, %v982_v34 }
  0xc8   :  { %v789_v63 = vpack.c.bf16 %v347_v61, %v345_v56  ;;  %v526_v32 = vmul.f32 %v347_v61, %v347_v61  ;;  %v504_v39 = vadd.f32 %v503_v31, %v347_v61 }
  0xc9   :  { %817 = vst [vmem:[%s1112_s4 + $0x10] sm:$0xff] %v749_v62   ;;  %v480_v38 = vadd.f32 %v479_v30, %v465_v27 }
  0xca   :  { %824 = vst [vmem:[%s1113_s5 + $0x10] sm:$0xff] %v789_v63   ;;  %v541_v48 = vadd.f32 %v540_v37, %v526_v32 }
  0xcc   :  { %v1040_v14 = vpop.f32.mrf.mxu2 }
  0xcd   :  { %v1042_v15 = vpop.f32.mrf.mxu3  ;;  %v769_v19 = vpack.c.bf16 %v1040_v14, %v1030_v58  ;;  %v473_v28 = vmul.f32 %v1040_v14, %v1040_v14 }
  0xce   :  { %v173_v18 = vpop.f32.mrf.mxu0  ;;  %v809_v21 = vpack.c.bf16 %v1042_v15, %v1032_v59 }
  0xcf   :  { %v350_v20 = vpop.f32.mrf.mxu1  ;;  %821 = vst [vmem:[%s1112_s4 + $0x30] sm:$0xff] %v769_v19   ;;  %v466_v33 = vmul.f32 %v173_v18, %v173_v18  ;;  %v444_v43 = vadd.f32 %v443_v36, %v173_v18 }
  0xd0   :  { %828 = vst [vmem:[%s1113_s5 + $0x30] sm:$0xff] %v809_v21   ;;  %v527_v42 = vmul.f32 %v350_v20, %v350_v20  ;;  %v505_v50 = vadd.f32 %v504_v39, %v350_v20 }
  0xd1   :  { %v481_v49 = vadd.f32 %v480_v38, %v466_v33 }
  0xd2   :  { %v542_v56 = vadd.f32 %v541_v48, %v527_v42 }
  0xd4   :  { %v193_v44 = vpop.f32.mrf.mxu2 }
  0xd5   :  { %v370_v45 = vpop.f32.mrf.mxu3  ;;  %v474_v36 = vmul.f32 %v193_v44, %v193_v44 }
  0xd6   :  { %v175_v51 = vpop.f32.mrf.mxu0  ;;  %v535_v39 = vmul.f32 %v370_v45, %v370_v45 }
  0xd7   :  { %v352_v54 = vpop.f32.mrf.mxu1  ;;  %v754_v55 = vpack.c.bf16 %v175_v51, %v173_v18  ;;  %v445_v57 = vadd.f32 %v444_v43, %v175_v51  ;;  %v467_v62 = vmul.f32 %v175_v51, %v175_v51 }
  0xd8   :  { %v794_v63 = vpack.c.bf16 %v352_v54, %v350_v20  ;;  %v506_v0 = vadd.f32 %v505_v50, %v352_v54  ;;  %v528_v1 = vmul.f32 %v352_v54, %v352_v54  ;;  %v471_v20 = vmul.f32 %v1016_v52, %v1016_v52 }
  0xd9   :  { %818 = vst [vmem:[%s1112_s4 + $0x18] sm:$0xff] %v754_v55   ;;  %v446_v61 = vadd.f32 %v445_v57, %v982_v34  ;;  %v482_v2 = vadd.f32 %v481_v49, %v467_v62  ;;  %v530_v34 = vmul.f32 %v994_v41, %v994_v41 }
  0xda   :  { %825 = vst [vmem:[%s1113_s5 + $0x18] sm:$0xff] %v794_v63   ;;  %v507_v4 = vadd.f32 %v506_v0, %v984_v35  ;;  %v543_v5 = vadd.f32 %v542_v56, %v528_v1 }
  0xdb   :  { %v447_v7 = vadd.f32 %v446_v61, %v992_v40  ;;  %v483_v8 = vadd.f32 %v482_v2, %v468_v60 }
  0xdc   :  { %v508_v9 = vadd.f32 %v507_v4, %v994_v41  ;;  %v544_v10 = vadd.f32 %v543_v5, %v529_v3  ;;  %v195_v35 = vpop.f32.mrf.mxu2 }
  0xdd   :  { %v448_v12 = vadd.f32 %v447_v7, %v1006_v46  ;;  %v484_v13 = vadd.f32 %v483_v8, %v469_v6  ;;  %v372_v16 = vpop.f32.mrf.mxu3  ;;  %v774_v19 = vpack.c.bf16 %v195_v35, %v193_v44  ;;  %v532_v46 = vmul.f32 %v1018_v53, %v1018_v53 }
  0xde   :  { %v509_v40 = vadd.f32 %v508_v9, %v1008_v47  ;;  %v545_v18 = vadd.f32 %v544_v10, %v530_v34  ;;  %v814_v22 = vpack.c.bf16 %v372_v16, %v370_v45  ;;  %v472_v47 = vmul.f32 %v1030_v58, %v1030_v58 }
  0xdf   :  { %v485_v41 = vadd.f32 %v484_v13, %v470_v11  ;;  %v449_v21 = vadd.f32 %v448_v12, %v1016_v52  ;;  %822 = vst [vmem:[%s1112_s4 + $0x38] sm:$0xff] %v774_v19   ;;  %v533_v52 = vmul.f32 %v1032_v59, %v1032_v59  ;;  %v475_v48 = vmul.f32 %v195_v35, %v195_v35 }
  0xe0   :  { %v546_v23 = vadd.f32 %v545_v18, %v531_v17  ;;  %v510_v24 = vadd.f32 %v509_v40, %v1018_v53  ;;  %829 = vst [vmem:[%s1113_s5 + $0x38] sm:$0xff] %v814_v22   ;;  %v536_v51 = vmul.f32 %v372_v16, %v372_v16 }
  0xe1   :  { %v450_v25 = vadd.f32 %v449_v21, %v1030_v58  ;;  %v486_v26 = vadd.f32 %v485_v41, %v471_v20  ;;  %v534_v58 = vmul.f32 %v1042_v15, %v1042_v15 }
  0xe2   :  { %v511_v27 = vadd.f32 %v510_v24, %v1032_v59  ;;  %v547_v53 = vadd.f32 %v546_v23, %v532_v46 }
  0xe3   :  { %v451_v29 = vadd.f32 %v450_v25, %v1040_v14  ;;  %v487_v30 = vadd.f32 %v486_v26, %v472_v47 }
  0xe4   :  { %v512_v31 = vadd.f32 %v511_v27, %v1042_v15  ;;  %v548_v32 = vadd.f32 %v547_v53, %v533_v52 }
  0xe5   :  { %v452_v33 = vadd.f32 %v451_v29, %v193_v44  ;;  %v488_v37 = vadd.f32 %v487_v30, %v473_v28 }
  0xe6   :  { %v513_v38 = vadd.f32 %v512_v31, %v370_v45  ;;  %v549_v42 = vadd.f32 %v548_v32, %v534_v58 }
  0xe7   :  { %v489_v59 = vadd.f32 %v488_v37, %v474_v36  ;;  %v453_v43 = vadd.f32 %v452_v33, %v195_v35 }
  0xe8   :  { %v550_v49 = vadd.f32 %v549_v42, %v535_v39  ;;  %v514_v50 = vadd.f32 %v513_v38, %v372_v16 }
  0xe9   :  { %v454_v14 = vrot.slane %v453_v43, 4  ;;  %v490_v54 = vadd.f32 %v489_v59, %v475_v48 }
  0xea   :  { %v515_v55 = vrot.slane %v514_v50, 4  ;;  %v551_v57 = vadd.f32 %v550_v49, %v536_v51 }
  0xeb   :  { %v455_v62 = vadd.f32 %v454_v14, %v453_v43  ;;  %v491_v63 = vrot.slane %v490_v54, 4 }
  0xec   :  { %v516_v15 = vadd.f32 %v515_v55, %v514_v50  ;;  %v552_v56 = vrot.slane %v551_v57, 4 }
  0xed   :  { %v456_v0 = vrot.slane %v455_v62, 2  ;;  %v492_v44 = vadd.f32 %v491_v63, %v490_v54 }
  0xee   :  { %v517_v1 = vrot.slane %v516_v15, 2  ;;  %v553_v60 = vadd.f32 %v552_v56, %v551_v57 }
  0xef   :  { %v457_v45 = vadd.f32 %v456_v0, %v455_v62  ;;  %v493_v61 = vrot.slane %v492_v44, 2 }
  0xf0   :  { %v518_v2 = vadd.f32 %v517_v1, %v516_v15  ;;  %v554_v3 = vrot.slane %v553_v60, 2 }
  0xf1   :  { %v458_v4 = vrot.slane %v457_v45, 1  ;;  %v494_v5 = vadd.f32 %v493_v61, %v492_v44 }
  0xf2   :  { %v519_v6 = vrot.slane %v518_v2, 1  ;;  %v555_v7 = vadd.f32 %v554_v3, %v553_v60 }
  0xf3   :  { %v495_v8 = vrot.slane %v494_v5, 1  ;;  %v459_v9 = vadd.f32 %v458_v4, %v457_v45 }
  0xf4   :  { %v556_v34 = vrot.slane %v555_v7, 1  ;;  %v520_v11 = vadd.f32 %v519_v6, %v518_v2 }
  0xf5   :  { %v496_v10 = vadd.f32 %v495_v8, %v494_v5 }
  0xf6   :  { %v557_v12 = vadd.f32 %v556_v34, %v555_v7 }
  0xf7   :  { %v498_v13 = vsel %vm497_vm0, %v459_v9, %v496_v10 }
  0xf8   :  { %499 = vst [vmem:[%s1114_s6] sm:$0x3] %v498_v13  ;;  %v558_v35 = vsel %vm497_vm0, %v520_v11, %v557_v12 }
  0xf9   :  { %559 = vst [vmem:[%s1115_s7] sm:$0x3] %v558_v35 }

</bundles_post_ra>
